<compile_context>
chip_gen: v5e
topology: v5e:2x2
jax: 0.10.0
libtpu: 0.0.40
codegen_flags: <defaults>
</compile_context>

<pallas_src>
import functools

import jax
import jax.numpy as jnp
from jax.experimental import pallas as pl
from jax.experimental.pallas import tpu as pltpu


# --- flat parameter packing (all weights live in one small SMEM vector) ------
OFF_W1   = 0                    # Conv1d weight  (3,3,2): idx = o*6 + c*2 + k
OFF_B1   = OFF_W1 + 18          # Conv1d bias    (3,)
OFF_WQ2  = OFF_B1 + 3           # Qconv1d_2 angles (2,3,2): idx = w*6 + c*2 + k
OFF_WQ3  = OFF_WQ2 + 12         # Qconv1d_3 angles (3,)
OFF_ASE  = OFF_WQ3 + 3          # QSE encoding scale (2,)
OFF_CSE  = OFF_ASE + 2          # QSE phase (2,)
OFF_VSE  = OFF_CSE + 2          # QSE readout mix (2,)
OFF_BSE  = OFF_VSE + 2          # QSE bias (1,)
OFF_WLIN = OFF_BSE + 1          # Linear(2,1) weight, PyTorch layout (1,2)=[out,in]
OFF_BLIN = OFF_WLIN + 2         # Linear bias (1,)
N_PARAMS = OFF_BLIN + 1         # = 46


def pack_params(params):
    """Flatten all parameters (C order) into one float32 vector for SMEM.

    Call ONCE at init; the hot path takes the pre-packed vector directly.
    """
    flat = jnp.concatenate([jnp.asarray(p, jnp.float32).reshape(-1) for p in params])
    assert flat.shape[0] == N_PARAMS, flat.shape
    return flat


def qtcn2_kernel(x_ref, p_ref, out_ref, *, C, L):
    # x_ref: (B, C*L) float32 in VMEM  (channel c = lanes [c*L, (c+1)*L))
    # p_ref: (N_PARAMS,) float32 in SMEM  (all weights as scalars)
    # out_ref: (B, 1) float32 in VMEM
    Lo = L - 1            # Conv1d output length
    Tq = Lo - 2           # Qconv1d_2 output length (= L - 3)

    def p(i):                              # scalar SMEM read (static index)
        return p_ref[i]

    # Hoist scalar weight reads (each read exactly once).
    W1 = [[[p(OFF_W1 + o * 6 + c * 2 + k) for k in range(2)]
           for c in range(3)] for o in range(3)]
    B1 = [p(OFF_B1 + o) for o in range(3)]
    WQ2 = [[[p(OFF_WQ2 + w * 6 + c * 2 + k) for k in range(2)]
            for c in range(3)] for w in range(2)]
    WQ3 = [p(OFF_WQ3 + c) for c in range(3)]
    w_lin0 = p(OFF_WLIN + 0)
    w_lin1 = p(OFF_WLIN + 1)
    w_lin_sum = w_lin0 + w_lin1            # residual broadcast folded into the tail
    b_lin = p(OFF_BLIN)

    # One contiguous (B, L) load per channel — time in lanes, batch in sublanes.
    xc = [x_ref[:, pl.ds(c * L, L)] for c in range(C)]

    # ---- skip path: Qconv1d_3 surrogate over the last Tq time steps ---------
    xw = [xc[c][:, L - Tq:] for c in range(3)]                     # 3 x (B, Tq)
    pre3 = WQ3[0] * xw[0] + WQ3[1] * xw[1] + WQ3[2] * xw[2]        # (B, Tq)
    x3w = jnp.cos(pre3)                                            # (B, Tq)  EUP

    # QSE surrogate: squeeze (mean over time) -> 2-wire readout -> sigmoid gate
    m = jnp.mean(x3w, axis=1, keepdims=True)                       # (B, 1) lane reduce
    e0 = jnp.cos(m * p(OFF_ASE + 0) + p(OFF_CSE + 0))              # (B, 1)
    e1 = jnp.cos(m * p(OFF_ASE + 1) + p(OFF_CSE + 1))              # (B, 1)
    gate = jax.nn.sigmoid(e0 * p(OFF_VSE + 0) + e1 * p(OFF_VSE + 1)
                          + p(OFF_BSE))                            # (B, 1)
    skip_last = x3w[:, Tq - 1:Tq] * gate                           # (B, 1)

    # ---- main path (dead-code eliminated to the only output-reachable step) -
    # Only x2[:, :, -1] reaches the output.  It needs Conv1d outputs at time
    # positions Tq-1 and Tq+1 (dilation 2), which only touch x columns L-4..L-1.
    # Compute the conv full-width on that slab via two lane-shifted views, so
    # the whole slab costs one MAC chain instead of two per-column chains.
    t0 = [xc[c][:, L - 4:L - 1] for c in range(3)]                 # (B, 3) taps k=0
    t1 = [xc[c][:, L - 3:L] for c in range(3)]                     # (B, 3) taps k=1
    h = [
        (W1[o][0][0] * t0[0] + W1[o][0][1] * t1[0] +
         W1[o][1][0] * t0[1] + W1[o][1][1] * t1[1] +
         W1[o][2][0] * t0[2] + W1[o][2][1] * t1[2] + B1[o])
        for o in range(3)
    ]                                       # (B, 3): conv at times Tq-1, Tq, Tq+1
    ha = [h[c][:, 0:1] for c in range(3)]   # conv output at Tq-1 (dilated tap k=0)
    hb = [h[c][:, 2:3] for c in range(3)]   # conv output at Tq+1 (dilated tap k=1)

    # Qconv1d_2 surrogate, last output position only -> 2 x (B, 1)
    x2_last = [
        jnp.cos(WQ2[w][0][0] * ha[0] + WQ2[w][0][1] * hb[0] +
                WQ2[w][1][0] * ha[1] + WQ2[w][1][1] * hb[1] +
                WQ2[w][2][0] * ha[2] + WQ2[w][2][1] * hb[2])
        for w in range(2)
    ]

    # ---- residual add + last step + Linear(2, 1), folded --------------------
    # (x2a + skip)*w0 + (x2b + skip)*w1 + b == x2a*w0 + x2b*w1 + skip*(w0+w1) + b
    out = (x2_last[0] * w_lin0 + x2_last[1] * w_lin1
           + skip_last * w_lin_sum + b_lin)
    out_ref[...] = out.astype(out_ref.dtype)


@jax.jit
def qtcn2_forward(x, p_flat):
    """x: (B, 3, L) float32 NCL; p_flat: (46,) float32 pre-packed parameters."""
    B, C, L = x.shape
    assert C == 3 and L >= 4
    # Free reshape (NCL is contiguous): no transpose, no extra HBM round trip.
    x_flat = x.reshape(B, C * L).astype(jnp.float32)               # (B, C*L)
    # NOTE: (B, 1) output is a masked store; fine at B=2.  For large batches
    # emit a lane-dense output and reshape in the wrapper (see header notes).
    return pl.pallas_call(
        functools.partial(qtcn2_kernel, C=C, L=L),
        out_shape=jax.ShapeDtypeStruct((B, 1), jnp.float32),
        in_specs=[
            pl.BlockSpec(memory_space=pltpu.MemorySpace.VMEM),     # x (one DMA)
            pl.BlockSpec(memory_space=pltpu.MemorySpace.SMEM),     # packed scalars
        ],
        out_specs=pl.BlockSpec(memory_space=pltpu.MemorySpace.VMEM),
    )(x_flat, p_flat)


def qtcn2_reference(x, params):
    """Pure-JAX reference of the full (un-DCE'd) surrogate forward pass."""
    w1, b1, wq2, wq3, a_se, c_se, v_se, b_se, w_lin, b_lin = params
    B, C, L = x.shape
    Lo, Tq = L - 1, L - 3
    # Conv1d(3->3, k=2)
    x1 = b1[None, :, None] + sum(
        jnp.einsum('oc,bct->bot', w1[:, :, k], x[:, :, k:k + Lo]) for k in range(2))
    # Qconv1d_2 surrogate (wires=2, dilation=2)
    pre2 = sum(jnp.einsum('wc,bct->bwt', wq2[:, :, k], x1[:, :, 2 * k:2 * k + Tq])
               for k in range(2))
    x2 = jnp.cos(pre2)                                             # (B, 2, Tq)
    # Qconv1d_3 surrogate (wires=1)
    x3 = jnp.cos(jnp.einsum('c,bct->bt', wq3, x))[:, None, :]      # (B, 1, L)
    x_skip = x3[:, :, L - Tq:]                                     # (B, 1, Tq)
    # QSE surrogate
    m = jnp.mean(x_skip, axis=2)                                   # (B, 1)
    e = jnp.cos(m * a_se[None, :] + c_se[None, :])                 # (B, 2)
    gate = jax.nn.sigmoid(jnp.sum(e * v_se[None, :], axis=1, keepdims=True) + b_se)
    x_skip = x_skip * gate[:, :, None]
    # residual add + last step + Linear(2, 1)
    last = (x2 + x_skip)[:, :, -1]                                 # (B, 2)
    return last @ w_lin.T + b_lin[None, :]                         # (B, 1)


def init_params():
    """Deterministic synthetic parameters (shapes implied by the module)."""
    keys = jax.random.split(jax.random.PRNGKey(42), 10)
    s = 0.5
    w1    = s * jax.random.normal(keys[0], (3, 3, 2), jnp.float32)  # Conv1d weight
    b1    = s * jax.random.normal(keys[1], (3,),      jnp.float32)  # Conv1d bias
    wq2   = s * jax.random.normal(keys[2], (2, 3, 2), jnp.float32)  # Qconv1d_2 angles
    wq3   = s * jax.random.normal(keys[3], (3,),      jnp.float32)  # Qconv1d_3 angles
    a_se  = s * jax.random.normal(keys[4], (2,),      jnp.float32)  # QSE encoding
    c_se  = s * jax.random.normal(keys[5], (2,),      jnp.float32)  # QSE phase
    v_se  = s * jax.random.normal(keys[6], (2,),      jnp.float32)  # QSE readout mix
    b_se  = s * jax.random.normal(keys[7], (1,),      jnp.float32)  # QSE bias
    w_lin = s * jax.random.normal(keys[8], (1, 2),    jnp.float32)  # Linear weight [out,in]
    b_lin = s * jax.random.normal(keys[9], (1,),      jnp.float32)  # Linear bias
    params = (w1, b1, wq2, wq3, a_se, c_se, v_se, b_se, w_lin, b_lin)
    # Pre-pack ONCE here so the per-call hot path is a single pallas_call.
    return params, pack_params(params)


if __name__ == "__main__":
    key = jax.random.PRNGKey(0)
    B, C, L = 2, 3, 16                       # batch=2, in_channels=3, seq_len=16
    x = jax.random.normal(key, (B, C, L), jnp.float32)

    params, p_flat = init_params()           # packing happens once, outside the hot path
    out = qtcn2_forward(x, p_flat)
    out = jax.block_until_ready(out)

    assert out.shape == (B, 1), out.shape
    assert out.dtype == jnp.float32
    assert bool(jnp.all(jnp.isfinite(out)))

    # Validate the dead-code-eliminated kernel against the full reference math.
    ref = qtcn2_reference(x, params)
    assert bool(jnp.allclose(out, ref, rtol=1e-3, atol=1e-3)), (out, ref)

    print("KERNEL_OK")
</pallas_src>

<mosaic_0001>
module attributes {stable_mosaic.version = 11 : i64} {
  func.func @qtcn2_kernel(%arg0: memref<2x48xf32, #tpu.memory_space<vmem>>, %arg1: memref<46xf32, #tpu.memory_space<smem>>, %arg2: memref<2x1xf32, #tpu.memory_space<vmem>>) attributes {dimension_semantics = [], scalar_prefetch = 0 : i64, scratch_operands = 0 : i64, tpu.core_type = #tpu.core_type<tc>} {
    %c0 = arith.constant 0 : index
    %0 = memref.load %arg1[%c0] : memref<46xf32, #tpu.memory_space<smem>>
    %c1 = arith.constant 1 : index
    %1 = memref.load %arg1[%c1] : memref<46xf32, #tpu.memory_space<smem>>
    %c2 = arith.constant 2 : index
    %2 = memref.load %arg1[%c2] : memref<46xf32, #tpu.memory_space<smem>>
    %c3 = arith.constant 3 : index
    %3 = memref.load %arg1[%c3] : memref<46xf32, #tpu.memory_space<smem>>
    %c4 = arith.constant 4 : index
    %4 = memref.load %arg1[%c4] : memref<46xf32, #tpu.memory_space<smem>>
    %c5 = arith.constant 5 : index
    %5 = memref.load %arg1[%c5] : memref<46xf32, #tpu.memory_space<smem>>
    %c6 = arith.constant 6 : index
    %6 = memref.load %arg1[%c6] : memref<46xf32, #tpu.memory_space<smem>>
    %c7 = arith.constant 7 : index
    %7 = memref.load %arg1[%c7] : memref<46xf32, #tpu.memory_space<smem>>
    %c8 = arith.constant 8 : index
    %8 = memref.load %arg1[%c8] : memref<46xf32, #tpu.memory_space<smem>>
    %c9 = arith.constant 9 : index
    %9 = memref.load %arg1[%c9] : memref<46xf32, #tpu.memory_space<smem>>
    %c10 = arith.constant 10 : index
    %10 = memref.load %arg1[%c10] : memref<46xf32, #tpu.memory_space<smem>>
    %c11 = arith.constant 11 : index
    %11 = memref.load %arg1[%c11] : memref<46xf32, #tpu.memory_space<smem>>
    %c12 = arith.constant 12 : index
    %12 = memref.load %arg1[%c12] : memref<46xf32, #tpu.memory_space<smem>>
    %c13 = arith.constant 13 : index
    %13 = memref.load %arg1[%c13] : memref<46xf32, #tpu.memory_space<smem>>
    %c14 = arith.constant 14 : index
    %14 = memref.load %arg1[%c14] : memref<46xf32, #tpu.memory_space<smem>>
    %c15 = arith.constant 15 : index
    %15 = memref.load %arg1[%c15] : memref<46xf32, #tpu.memory_space<smem>>
    %c16 = arith.constant 16 : index
    %16 = memref.load %arg1[%c16] : memref<46xf32, #tpu.memory_space<smem>>
    %c17 = arith.constant 17 : index
    %17 = memref.load %arg1[%c17] : memref<46xf32, #tpu.memory_space<smem>>
    %c18 = arith.constant 18 : index
    %18 = memref.load %arg1[%c18] : memref<46xf32, #tpu.memory_space<smem>>
    %c19 = arith.constant 19 : index
    %19 = memref.load %arg1[%c19] : memref<46xf32, #tpu.memory_space<smem>>
    %c20 = arith.constant 20 : index
    %20 = memref.load %arg1[%c20] : memref<46xf32, #tpu.memory_space<smem>>
    %c21 = arith.constant 21 : index
    %21 = memref.load %arg1[%c21] : memref<46xf32, #tpu.memory_space<smem>>
    %c22 = arith.constant 22 : index
    %22 = memref.load %arg1[%c22] : memref<46xf32, #tpu.memory_space<smem>>
    %c23 = arith.constant 23 : index
    %23 = memref.load %arg1[%c23] : memref<46xf32, #tpu.memory_space<smem>>
    %c24 = arith.constant 24 : index
    %24 = memref.load %arg1[%c24] : memref<46xf32, #tpu.memory_space<smem>>
    %c25 = arith.constant 25 : index
    %25 = memref.load %arg1[%c25] : memref<46xf32, #tpu.memory_space<smem>>
    %c26 = arith.constant 26 : index
    %26 = memref.load %arg1[%c26] : memref<46xf32, #tpu.memory_space<smem>>
    %c27 = arith.constant 27 : index
    %27 = memref.load %arg1[%c27] : memref<46xf32, #tpu.memory_space<smem>>
    %c28 = arith.constant 28 : index
    %28 = memref.load %arg1[%c28] : memref<46xf32, #tpu.memory_space<smem>>
    %c29 = arith.constant 29 : index
    %29 = memref.load %arg1[%c29] : memref<46xf32, #tpu.memory_space<smem>>
    %c30 = arith.constant 30 : index
    %30 = memref.load %arg1[%c30] : memref<46xf32, #tpu.memory_space<smem>>
    %c31 = arith.constant 31 : index
    %31 = memref.load %arg1[%c31] : memref<46xf32, #tpu.memory_space<smem>>
    %c32 = arith.constant 32 : index
    %32 = memref.load %arg1[%c32] : memref<46xf32, #tpu.memory_space<smem>>
    %c33 = arith.constant 33 : index
    %33 = memref.load %arg1[%c33] : memref<46xf32, #tpu.memory_space<smem>>
    %c34 = arith.constant 34 : index
    %34 = memref.load %arg1[%c34] : memref<46xf32, #tpu.memory_space<smem>>
    %c35 = arith.constant 35 : index
    %35 = memref.load %arg1[%c35] : memref<46xf32, #tpu.memory_space<smem>>
    %c43 = arith.constant 43 : index
    %36 = memref.load %arg1[%c43] : memref<46xf32, #tpu.memory_space<smem>>
    %c44 = arith.constant 44 : index
    %37 = memref.load %arg1[%c44] : memref<46xf32, #tpu.memory_space<smem>>
    %38 = arith.addf %36, %37 : f32
    %c45 = arith.constant 45 : index
    %39 = memref.load %arg1[%c45] : memref<46xf32, #tpu.memory_space<smem>>
    %c0_0 = arith.constant 0 : index
    %c0_1 = arith.constant 0 : index
    %40 = vector.load %arg0[%c0_0, %c0_1] : memref<2x48xf32, #tpu.memory_space<vmem>>, vector<2x16xf32>
    %c0_2 = arith.constant 0 : index
    %c16_3 = arith.constant 16 : index
    %41 = vector.load %arg0[%c0_2, %c16_3] : memref<2x48xf32, #tpu.memory_space<vmem>>, vector<2x16xf32>
    %c0_4 = arith.constant 0 : index
    %c32_5 = arith.constant 32 : index
    %42 = vector.load %arg0[%c0_4, %c32_5] : memref<2x48xf32, #tpu.memory_space<vmem>>, vector<2x16xf32>
    %43 = vector.extract_strided_slice %40 {offsets = [0, 3], sizes = [2, 13], strides = [1, 1]} : vector<2x16xf32> to vector<2x13xf32>
    %44 = vector.extract_strided_slice %41 {offsets = [0, 3], sizes = [2, 13], strides = [1, 1]} : vector<2x16xf32> to vector<2x13xf32>
    %45 = vector.extract_strided_slice %42 {offsets = [0, 3], sizes = [2, 13], strides = [1, 1]} : vector<2x16xf32> to vector<2x13xf32>
    %46 = vector.broadcast %33 : f32 to vector<2x13xf32>
    %47 = arith.mulf %46, %43 : vector<2x13xf32>
    %48 = vector.broadcast %34 : f32 to vector<2x13xf32>
    %49 = arith.mulf %48, %44 : vector<2x13xf32>
    %50 = arith.addf %47, %49 : vector<2x13xf32>
    %51 = vector.broadcast %35 : f32 to vector<2x13xf32>
    %52 = arith.mulf %51, %45 : vector<2x13xf32>
    %53 = arith.addf %50, %52 : vector<2x13xf32>
    %54 = math.cos %53 : vector<2x13xf32>
    %cst = arith.constant dense<0.000000e+00> : vector<2xf32>
    %55 = vector.multi_reduction <add>, %54, %cst [1] : vector<2x13xf32> to vector<2xf32>
    %56 = vector.shape_cast %55 : vector<2xf32> to vector<2x1xf32>
    %cst_6 = arith.constant 1.300000e+01 : f32
    %57 = vector.broadcast %cst_6 : f32 to vector<2x1xf32>
    %58 = arith.divf %56, %57 : vector<2x1xf32>
    %c36 = arith.constant 36 : index
    %59 = memref.load %arg1[%c36] : memref<46xf32, #tpu.memory_space<smem>>
    %60 = vector.broadcast %59 : f32 to vector<2x1xf32>
    %61 = arith.mulf %58, %60 : vector<2x1xf32>
    %c38 = arith.constant 38 : index
    %62 = memref.load %arg1[%c38] : memref<46xf32, #tpu.memory_space<smem>>
    %63 = vector.broadcast %62 : f32 to vector<2x1xf32>
    %64 = arith.addf %61, %63 : vector<2x1xf32>
    %65 = math.cos %64 : vector<2x1xf32>
    %c37 = arith.constant 37 : index
    %66 = memref.load %arg1[%c37] : memref<46xf32, #tpu.memory_space<smem>>
    %67 = vector.broadcast %66 : f32 to vector<2x1xf32>
    %68 = arith.mulf %58, %67 : vector<2x1xf32>
    %c39 = arith.constant 39 : index
    %69 = memref.load %arg1[%c39] : memref<46xf32, #tpu.memory_space<smem>>
    %70 = vector.broadcast %69 : f32 to vector<2x1xf32>
    %71 = arith.addf %68, %70 : vector<2x1xf32>
    %72 = math.cos %71 : vector<2x1xf32>
    %c40 = arith.constant 40 : index
    %73 = memref.load %arg1[%c40] : memref<46xf32, #tpu.memory_space<smem>>
    %74 = vector.broadcast %73 : f32 to vector<2x1xf32>
    %75 = arith.mulf %65, %74 : vector<2x1xf32>
    %c41 = arith.constant 41 : index
    %76 = memref.load %arg1[%c41] : memref<46xf32, #tpu.memory_space<smem>>
    %77 = vector.broadcast %76 : f32 to vector<2x1xf32>
    %78 = arith.mulf %72, %77 : vector<2x1xf32>
    %79 = arith.addf %75, %78 : vector<2x1xf32>
    %c42 = arith.constant 42 : index
    %80 = memref.load %arg1[%c42] : memref<46xf32, #tpu.memory_space<smem>>
    %81 = vector.broadcast %80 : f32 to vector<2x1xf32>
    %82 = arith.addf %79, %81 : vector<2x1xf32>
    %83 = arith.negf %82 : vector<2x1xf32>
    %84 = math.exp %83 : vector<2x1xf32>
    %cst_7 = arith.constant 1.000000e+00 : f32
    %85 = vector.broadcast %cst_7 : f32 to vector<2x1xf32>
    %86 = arith.addf %85, %84 : vector<2x1xf32>
    %87 = arith.divf %85, %86 : vector<2x1xf32>
    %88 = vector.extract_strided_slice %54 {offsets = [0, 12], sizes = [2, 1], strides = [1, 1]} : vector<2x13xf32> to vector<2x1xf32>
    %89 = arith.mulf %88, %87 : vector<2x1xf32>
    %90 = vector.extract_strided_slice %40 {offsets = [0, 12], sizes = [2, 3], strides = [1, 1]} : vector<2x16xf32> to vector<2x3xf32>
    %91 = vector.extract_strided_slice %41 {offsets = [0, 12], sizes = [2, 3], strides = [1, 1]} : vector<2x16xf32> to vector<2x3xf32>
    %92 = vector.extract_strided_slice %42 {offsets = [0, 12], sizes = [2, 3], strides = [1, 1]} : vector<2x16xf32> to vector<2x3xf32>
    %93 = vector.extract_strided_slice %40 {offsets = [0, 13], sizes = [2, 3], strides = [1, 1]} : vector<2x16xf32> to vector<2x3xf32>
    %94 = vector.extract_strided_slice %41 {offsets = [0, 13], sizes = [2, 3], strides = [1, 1]} : vector<2x16xf32> to vector<2x3xf32>
    %95 = vector.extract_strided_slice %42 {offsets = [0, 13], sizes = [2, 3], strides = [1, 1]} : vector<2x16xf32> to vector<2x3xf32>
    %96 = vector.broadcast %0 : f32 to vector<2x3xf32>
    %97 = arith.mulf %96, %90 : vector<2x3xf32>
    %98 = vector.broadcast %1 : f32 to vector<2x3xf32>
    %99 = arith.mulf %98, %93 : vector<2x3xf32>
    %100 = arith.addf %97, %99 : vector<2x3xf32>
    %101 = vector.broadcast %2 : f32 to vector<2x3xf32>
    %102 = arith.mulf %101, %91 : vector<2x3xf32>
    %103 = arith.addf %100, %102 : vector<2x3xf32>
    %104 = vector.broadcast %3 : f32 to vector<2x3xf32>
    %105 = arith.mulf %104, %94 : vector<2x3xf32>
    %106 = arith.addf %103, %105 : vector<2x3xf32>
    %107 = vector.broadcast %4 : f32 to vector<2x3xf32>
    %108 = arith.mulf %107, %92 : vector<2x3xf32>
    %109 = arith.addf %106, %108 : vector<2x3xf32>
    %110 = vector.broadcast %5 : f32 to vector<2x3xf32>
    %111 = arith.mulf %110, %95 : vector<2x3xf32>
    %112 = arith.addf %109, %111 : vector<2x3xf32>
    %113 = vector.broadcast %18 : f32 to vector<2x3xf32>
    %114 = arith.addf %112, %113 : vector<2x3xf32>
    %115 = vector.broadcast %6 : f32 to vector<2x3xf32>
    %116 = arith.mulf %115, %90 : vector<2x3xf32>
    %117 = vector.broadcast %7 : f32 to vector<2x3xf32>
    %118 = arith.mulf %117, %93 : vector<2x3xf32>
    %119 = arith.addf %116, %118 : vector<2x3xf32>
    %120 = vector.broadcast %8 : f32 to vector<2x3xf32>
    %121 = arith.mulf %120, %91 : vector<2x3xf32>
    %122 = arith.addf %119, %121 : vector<2x3xf32>
    %123 = vector.broadcast %9 : f32 to vector<2x3xf32>
    %124 = arith.mulf %123, %94 : vector<2x3xf32>
    %125 = arith.addf %122, %124 : vector<2x3xf32>
    %126 = vector.broadcast %10 : f32 to vector<2x3xf32>
    %127 = arith.mulf %126, %92 : vector<2x3xf32>
    %128 = arith.addf %125, %127 : vector<2x3xf32>
    %129 = vector.broadcast %11 : f32 to vector<2x3xf32>
    %130 = arith.mulf %129, %95 : vector<2x3xf32>
    %131 = arith.addf %128, %130 : vector<2x3xf32>
    %132 = vector.broadcast %19 : f32 to vector<2x3xf32>
    %133 = arith.addf %131, %132 : vector<2x3xf32>
    %134 = vector.broadcast %12 : f32 to vector<2x3xf32>
    %135 = arith.mulf %134, %90 : vector<2x3xf32>
    %136 = vector.broadcast %13 : f32 to vector<2x3xf32>
    %137 = arith.mulf %136, %93 : vector<2x3xf32>
    %138 = arith.addf %135, %137 : vector<2x3xf32>
    %139 = vector.broadcast %14 : f32 to vector<2x3xf32>
    %140 = arith.mulf %139, %91 : vector<2x3xf32>
    %141 = arith.addf %138, %140 : vector<2x3xf32>
    %142 = vector.broadcast %15 : f32 to vector<2x3xf32>
    %143 = arith.mulf %142, %94 : vector<2x3xf32>
    %144 = arith.addf %141, %143 : vector<2x3xf32>
    %145 = vector.broadcast %16 : f32 to vector<2x3xf32>
    %146 = arith.mulf %145, %92 : vector<2x3xf32>
    %147 = arith.addf %144, %146 : vector<2x3xf32>
    %148 = vector.broadcast %17 : f32 to vector<2x3xf32>
    %149 = arith.mulf %148, %95 : vector<2x3xf32>
    %150 = arith.addf %147, %149 : vector<2x3xf32>
    %151 = vector.broadcast %20 : f32 to vector<2x3xf32>
    %152 = arith.addf %150, %151 : vector<2x3xf32>
    %153 = vector.extract_strided_slice %114 {offsets = [0, 0], sizes = [2, 1], strides = [1, 1]} : vector<2x3xf32> to vector<2x1xf32>
    %154 = vector.extract_strided_slice %133 {offsets = [0, 0], sizes = [2, 1], strides = [1, 1]} : vector<2x3xf32> to vector<2x1xf32>
    %155 = vector.extract_strided_slice %152 {offsets = [0, 0], sizes = [2, 1], strides = [1, 1]} : vector<2x3xf32> to vector<2x1xf32>
    %156 = vector.extract_strided_slice %114 {offsets = [0, 2], sizes = [2, 1], strides = [1, 1]} : vector<2x3xf32> to vector<2x1xf32>
    %157 = vector.extract_strided_slice %133 {offsets = [0, 2], sizes = [2, 1], strides = [1, 1]} : vector<2x3xf32> to vector<2x1xf32>
    %158 = vector.extract_strided_slice %152 {offsets = [0, 2], sizes = [2, 1], strides = [1, 1]} : vector<2x3xf32> to vector<2x1xf32>
    %159 = vector.broadcast %21 : f32 to vector<2x1xf32>
    %160 = arith.mulf %159, %153 : vector<2x1xf32>
    %161 = vector.broadcast %22 : f32 to vector<2x1xf32>
    %162 = arith.mulf %161, %156 : vector<2x1xf32>
    %163 = arith.addf %160, %162 : vector<2x1xf32>
    %164 = vector.broadcast %23 : f32 to vector<2x1xf32>
    %165 = arith.mulf %164, %154 : vector<2x1xf32>
    %166 = arith.addf %163, %165 : vector<2x1xf32>
    %167 = vector.broadcast %24 : f32 to vector<2x1xf32>
    %168 = arith.mulf %167, %157 : vector<2x1xf32>
    %169 = arith.addf %166, %168 : vector<2x1xf32>
    %170 = vector.broadcast %25 : f32 to vector<2x1xf32>
    %171 = arith.mulf %170, %155 : vector<2x1xf32>
    %172 = arith.addf %169, %171 : vector<2x1xf32>
    %173 = vector.broadcast %26 : f32 to vector<2x1xf32>
    %174 = arith.mulf %173, %158 : vector<2x1xf32>
    %175 = arith.addf %172, %174 : vector<2x1xf32>
    %176 = math.cos %175 : vector<2x1xf32>
    %177 = vector.broadcast %27 : f32 to vector<2x1xf32>
    %178 = arith.mulf %177, %153 : vector<2x1xf32>
    %179 = vector.broadcast %28 : f32 to vector<2x1xf32>
    %180 = arith.mulf %179, %156 : vector<2x1xf32>
    %181 = arith.addf %178, %180 : vector<2x1xf32>
    %182 = vector.broadcast %29 : f32 to vector<2x1xf32>
    %183 = arith.mulf %182, %154 : vector<2x1xf32>
    %184 = arith.addf %181, %183 : vector<2x1xf32>
    %185 = vector.broadcast %30 : f32 to vector<2x1xf32>
    %186 = arith.mulf %185, %157 : vector<2x1xf32>
    %187 = arith.addf %184, %186 : vector<2x1xf32>
    %188 = vector.broadcast %31 : f32 to vector<2x1xf32>
    %189 = arith.mulf %188, %155 : vector<2x1xf32>
    %190 = arith.addf %187, %189 : vector<2x1xf32>
    %191 = vector.broadcast %32 : f32 to vector<2x1xf32>
    %192 = arith.mulf %191, %158 : vector<2x1xf32>
    %193 = arith.addf %190, %192 : vector<2x1xf32>
    %194 = math.cos %193 : vector<2x1xf32>
    %195 = vector.broadcast %36 : f32 to vector<2x1xf32>
    %196 = arith.mulf %176, %195 : vector<2x1xf32>
    %197 = vector.broadcast %37 : f32 to vector<2x1xf32>
    %198 = arith.mulf %194, %197 : vector<2x1xf32>
    %199 = arith.addf %196, %198 : vector<2x1xf32>
    %200 = vector.broadcast %38 : f32 to vector<2x1xf32>
    %201 = arith.mulf %89, %200 : vector<2x1xf32>
    %202 = arith.addf %199, %201 : vector<2x1xf32>
    %203 = vector.broadcast %39 : f32 to vector<2x1xf32>
    %204 = arith.addf %202, %203 : vector<2x1xf32>
    %c0_8 = arith.constant 0 : index
    %c0_9 = arith.constant 0 : index
    %205 = vector.load %arg2[%c0_8, %c0_9] : memref<2x1xf32, #tpu.memory_space<vmem>>, vector<2x1xf32>
    tpu.vector_store %arg2[%c0_8, %c0_9], %204 {strides = array<i32>} : memref<2x1xf32, #tpu.memory_space<vmem>>, vector<2x1xf32>,
    return
  }
}

</mosaic_0001>

<bundles_post_ra>
// kernel: qtcn2_forward.1
= control target key start
LH: loop header
LB: loop body
LE: loop exit
PB: predicated region body
PF: predicated region fallthrough
CT: control target
= control target key end

     0   :  { %7 = vsyncpa [#allocation3], 0  ;;  %s1207_s12 = smov [#allocation2]   ;;  %s1796_s0 = inlined_call_operand.vmem [shape: f32[2,48], index: 0, kind: input, shape index: {}]   ;;  %s1797_s1 = inlined_call_operand.vmem [shape: f32[46], index: 1, kind: input, shape index: {}]   ;;  %s1798_s2 = inlined_call_operand.vmem [shape: f32[2,1], index: 2, kind: output, shape index: {}]  }
   0x1   :  { %s15_s11 = sshll.u32 %s1797_s1, 4  ;;  %s16_s11 = int_to_ptr.vmem [resolvable:$true] %s15_s11 }
   0x2   :  { %18 = dma.vmem_to_smem %s16_s11, 16, %s1207_s12, [#allocation3]  }
   0x3   :  { %1205 = dma.done.wait [#allocation3], 16  }
   0x4   :  { %1206 = vsyncadd [#allocation3], 4294967280 }
   0x5   :  { %23 = sfence }
   0x6   :  { %s1142_s13 = sld [smem:[#allocation2 + $0x22]]  ;;  %v1245_v0 = vld [vmem:[%s1796_s0] sm:$0x3]  ;;  %s1208_s17 = smov 112   ;;  %v1213_v36 = vmov 2102212464  }
   0x7   :  { %s1143_s14 = sld [smem:[#allocation2 + $0x23]]  ;;  %s1209_s1 = smov 96   ;;  %v1214_v38 = vmov 920167782   ;;  %v1215_v42 = vmov 1326507024  }
   0x8   :  { %s1111_s18 = sld [smem:[#allocation2 + $0x3]]  ;;  %s1210_s0 = smov 111   ;;  %v1216_v44 = vmov 683565275   ;;  %v1217_v46 = vmov 2475754826  }
   0x9   :  { %s1109_s19 = sld [smem:[#allocation2 + $0x1]]  ;;  %s1211_s23 = smov 127   ;;  %v1218_v49 = vmov 2131351028  }
   0xa   :  { %s1141_s20 = sld [smem:[#allocation2 + $0x21]]  ;;  %s1212_s27 = smov 95  }
   0xb   :  { %s1112_s21 = sld [smem:[#allocation2 + $0x4]]  ;;  %s1220_s7 = smov 125  }
   0xc   :  { %v67_v1 = vstv %s1142_s13  ;;  %s1110_s22 = sld [smem:[#allocation2 + $0x2]]  ;;  %s1221_s10 = smov 126  }
   0xd   :  { %v68_v2 = vmul.f32 %v67_v1, %v1245_v0  ;;  %v74_v3 = vstv %s1143_s14  ;;  %s1113_s24 = sld [smem:[#allocation2 + $0x5]] }
   0xe   :  { %v75_v4 = vmul.f32 %v74_v3, %v1245_v0  ;;  %v617_v5 = vstv %s1111_s18  ;;  %s1115_s25 = sld [smem:[#allocation2 + $0x7]] }
   0xf   :  { %70 = vrot.lane.b32.xlu0 %v68_v2, %s1208_s17  ;;  %v603_v6 = vstv %s1109_s19  ;;  %v618_v7 = vmul.f32 %v617_v5, %v1245_v0  ;;  %s1116_s26 = sld [smem:[#allocation2 + $0x8]] }
  0x10   :  { %v604_v8 = vmul.f32 %v603_v6, %v1245_v0  ;;  %v65_v10 = vstv %s1141_s20  ;;  %s1268_s28 = sld [smem:[#allocation2 + $0x9]] }
  0x11   :  { %v624_v11 = vstv %s1112_s21  ;;  %v66_v13 = vmul.f32 %v65_v10, %v1245_v0  ;;  %s1118_s29 = sld [smem:[#allocation2 + $0xa]] }
  0x12   :  { %606 = vrot.lane.b32.xlu2 %v604_v8, %s1211_s23  ;;  %v610_v12 = vstv %s1110_s22  ;;  %v625_v14 = vmul.f32 %v624_v11, %v1245_v0  ;;  %s1121_s30 = sld [smem:[#allocation2 + $0xd]] }
  0x13   :  { %v611_v15 = vmul.f32 %v610_v12, %v1245_v0  ;;  %v631_v19 = vstv %s1113_s24  ;;  %s1119_s3 = sld [smem:[#allocation2 + $0xb]] }
  0x14   :  { %v642_v20 = vstv %s1115_s25  ;;  %v632_v22 = vmul.f32 %v631_v19, %v1245_v0  ;;  %s1122_s4 = sld [smem:[#allocation2 + $0xe]] }
  0x15   :  { %v643_v23 = vmul.f32 %v642_v20, %v1245_v0  ;;  %v649_v28 = vstv %s1116_s26  ;;  %s1124_s5 = sld [smem:[#allocation2 + $0x10]] }
  0x16   :  { %v650_v31 = vmul.f32 %v649_v28, %v1245_v0  ;;  %v656_v40 = vstv %s1268_s28  ;;  %s24_s6 = sld [smem:[#allocation2]] }
  0x17   :  { %77 = vrot.lane.b32.xlu0 %v75_v4, %s1209_s1  ;;  %v657_v57 = vmul.f32 %v656_v40, %v1245_v0  ;;  %s1126_s8 = sld [smem:[#allocation2 + $0x12]] }
  0x18   :  { %s1130_s9 = sld [smem:[#allocation2 + $0x16]] }
  0x19   :  { %s1114_s11 = sld [smem:[#allocation2 + $0x6]] }
  0x1a   :  { %613 = vrot.lane.b32.xlu2 %v611_v15, %s1208_s17  ;;  %s1127_s12 = sld [smem:[#allocation2 + $0x13]] }
  0x1b   :  { %s1132_s13 = sld [smem:[#allocation2 + $0x18]] }
  0x1c   :  { %s1125_s14 = sld [smem:[#allocation2 + $0x11]] }
  0x1d   :  { %s1136_s15 = sld [smem:[#allocation2 + $0x1c]] }
  0x1e   :  { %s1138_s16 = sld [smem:[#allocation2 + $0x1e]] }
  0x1f   :  { %620 = vrot.lane.b32.xlu0 %v618_v7, %s1210_s0  ;;  %s1155_s18 = sld [smem:[#allocation2 + $0x25]] }
  0x20   :  { %s1151_s19 = sld [smem:[#allocation2 + $0x26]] }
  0x21   :  { %s1156_s20 = sld [smem:[#allocation2 + $0x27]] }
  0x22   :  { %645 = vrot.lane.b32.xlu2 %v643_v23, %s1211_s23  ;;  %s1120_s21 = sld [smem:[#allocation2 + $0xc]] }
  0x23   :  { %s1512_s22 = sld [smem:[#allocation2 + $0x14]] }
  0x24   :  { %s1579_s24 = sld [smem:[#allocation2 + $0x28]] }
  0x25   :  { %s1161_s25 = sld [smem:[#allocation2 + $0x29]] }
  0x26   :  { %s1162_s26 = sld [smem:[#allocation2 + $0x2a]] }
  0x27   :  { %627 = vrot.lane.b32.xlu0 %v625_v14, %s1209_s1  ;;  %s1591_s28 = sld [smem:[#allocation2 + $0x2c]] }
  0x2a   :  { %652 = vrot.lane.b32.xlu2 %v650_v31, %s1208_s17 }
  0x2f   :  { %634 = vrot.lane.b32.xlu0 %v632_v22, %s1212_s27 }
  0x32   :  { %659 = vrot.lane.b32.xlu2 %v657_v57, %s1210_s0 }
  0x81   :  { %v71_v9 = vpop.permute.xlu0 %70 }
  0x82   :  { %v73_v16 = vadd.f32 %v71_v9, %v66_v13 }
  0x89   :  { %v78_v17 = vpop.permute.xlu0 %77 }
  0x8a   :  { %v1260_v18 = vadd.f32 %v78_v17, %v73_v16 }
  0x8c   :  { %v84_v21 = vand.u32 2139095040, %v1260_v18  ;;  %v81_v26 = vand.u32 2147483647, %v1260_v18  ;;  %vm83_vm12 = vcmp.lt.s32.totalorder %v1260_v18, 0 }
  0x8e   :  { %v85_v24 = vshrl.u32 %v84_v21, 23  ;;  %v88_v29 = vand.u32 8388607, %v81_v26  ;;  %vm1343_vm13 = vcmp.le.f32.partialorder %v81_v26, 0.7853982 }
  0x90   :  { %v1147_v25 = vadd.s32 4294967169, %v85_v24  ;;  %v89_v34 = vor.u32 8388608, %v88_v29 }
  0x92   :  { %v91_v27 = vadd.s32 1, %v1147_v25  ;;  %v1294_v56 = vshll.u32 %v89_v34, 8 }
  0x94   :  { %vm92_vm0 = vcmp.gt.s32.totalorder %v91_v27, 0  ;;  %v130_v4 = vand.u32 65535, %v1294_v56  ;;  %v131_v6 = vshrl.u32 %v1294_v56, 16 }
  0x95   :  { %v93_v30 = vsel %vm92_vm0, %v91_v27, 0  ;;  %v1219_v27 = vmov 0  }
  0x96   :  { %v95_v32 = vand.u32 31, %v93_v30  ;;  %v1275_v35 = vshrl.u32 %v93_v30, 5 }
  0x98   :  { %v1273_v33 = vsub.s32 32, %v95_v32  ;;  %v107_v37 = vshll.u32 %v1213_v36, %v95_v32  ;;  %v110_v39 = vshll.u32 %v1214_v38, %v95_v32  ;;  %v98_v45 = vshll.u32 %v1216_v44, %v95_v32 }
  0x99   :  { %v101_v48 = vshll.u32 %v1217_v46, %v95_v32  ;;  %v104_v51 = vshll.u32 %v1218_v49, %v95_v32  ;;  %vm116_vm1 = vcmp.lt.s32.totalorder %v1275_v35, 4  ;;  %vm113_vm2 = vcmp.lt.s32.totalorder %v1275_v35, 1 }
  0x9a   :  { %v108_v41 = vshrl.u32 %v1214_v38, %v1273_v33  ;;  %v111_v43 = vshrl.u32 %v1215_v42, %v1273_v33  ;;  %v99_v47 = vshrl.u32 %v1217_v46, %v1273_v33  ;;  %v102_v50 = vshrl.u32 %v1218_v49, %v1273_v33 }
  0x9b   :  { %v105_v52 = vshrl.u32 %v1213_v36, %v1273_v33  ;;  %vm115_vm3 = vcmp.lt.s32.totalorder %v1275_v35, 3  ;;  %vm114_vm4 = vcmp.lt.s32.totalorder %v1275_v35, 2  ;;  %v97_v32 = vshrl.u32 %v1216_v44, %v1273_v33 }
  0x9c   :  { %v109_v53 = vor.u32 %v108_v41, %v107_v37  ;;  %v112_v54 = vor.u32 %v111_v43, %v110_v39  ;;  %v100_v55 = vor.u32 %v99_v47, %v98_v45  ;;  %v103_v58 = vor.u32 %v102_v50, %v101_v48 }
  0x9d   :  { %v106_v59 = vor.u32 %v105_v52, %v104_v51 }
  0x9e   :  { %v122_v60 = vsel %vm116_vm1, %v109_v53, 920167782  ;;  %v126_v61 = vsel %vm116_vm1, %v112_v54, 1326507024  ;;  %v121_v62 = vsel %vm113_vm2, %v100_v55, %v103_v58  ;;  %v117_v43 = vsel %vm113_vm2, %v97_v32, %v100_v55 }
  0x9f   :  { %v123_v63 = vsel %vm115_vm3, %v106_v59, %v122_v60  ;;  %v125_v1 = vsel %vm113_vm2, %v103_v58, %v106_v59  ;;  %v127_v3 = vsel %vm115_vm3, %v109_v53, %v126_v61  ;;  %v118_v29 = vsel %vm116_vm1, %v106_v59, 2102212464 }
  0xa0   :  { %v124_v2 = vsel %vm114_vm4, %v121_v62, %v123_v63  ;;  %v128_v5 = vsel %vm114_vm4, %v125_v1, %v127_v3  ;;  %v119_v45 = vsel %vm115_vm3, %v103_v58, %v118_v29  ;;  %vm224_vm1 = vweird.f32 %v1260_v18 }
  0xa1   :  { %v154_v7 = vand.u32 65535, %v124_v2  ;;  %v155_v8 = vshrl.u32 %v124_v2, 16  ;;  %v132_v9 = vand.u32 65535, %v128_v5  ;;  %v133_v10 = vshrl.u32 %v128_v5, 16 }
  0xa2   :  { %v120_v53 = vsel %vm114_vm4, %v117_v43, %v119_v45  ;;  %v702_v43 = vstv %s1124_s5  ;;  %v677_v29 = vstv %s1127_s12  ;;  %vm239_vm2 = vcmask 99328   ;;  %s1131_s5 = sld [smem:[#allocation2 + $0x17]] }
  0xa3   :  { %v157_v11 = vmul.u32 %v155_v8, %v130_v4  ;;  %v158_v12 = vmul.u32 %v154_v7, %v131_v6  ;;  %v135_v13 = vmul.u32 %v133_v10, %v130_v4  ;;  %v136_v14 = vmul.u32 %v132_v9, %v131_v6 }
  0xa4   :  { %v156_v15 = vmul.u32 %v154_v7, %v130_v4  ;;  %v134_v17 = vmul.u32 %v132_v9, %v130_v4  ;;  %v159_v20 = vmul.u32 %v155_v8, %v131_v6  ;;  %v137_v21 = vmul.u32 %v133_v10, %v131_v6 }
  0xa5   :  { %v160_v16 = vshll.u32 %v157_v11, 16  ;;  %v138_v19 = vshll.u32 %v135_v13, 16  ;;  %v162_v22 = vshll.u32 %v158_v12, 16  ;;  %v140_v24 = vshll.u32 %v136_v14, 16 }
  0xa6   :  { %v161_v40 = vshrl.u32 %v157_v11, 16  ;;  %v139_v47 = vshrl.u32 %v135_v13, 16  ;;  %v163_v50 = vshrl.u32 %v158_v12, 16  ;;  %v141_v52 = vshrl.u32 %v136_v14, 16 }
  0xa7   :  { %vm164_vm5 = vc.u32 %v156_v15, %v160_v16  ;;  %v166_v23 = vadd.s32 %v160_v16, %v156_v15  ;;  %vm142_vm6 = vc.u32 %v134_v17, %v138_v19  ;;  %v144_v25 = vadd.s32 %v138_v19, %v134_v17 }
  0xa8   :  { %v165_v28 = vsel %vm164_vm5, 1, %v1219_v27  ;;  %v143_v30 = vsel %vm142_vm6, 1, %v1219_v27  ;;  %v174_v61 = vmul.u32 %v1294_v56, %v120_v53  ;;  %v663_v14 = vstv %s1118_s29 }
  0xa9   :  { %v167_v31 = vadd.s32 %v165_v28, %v159_v20  ;;  %vm168_vm7 = vc.u32 %v166_v23, %v162_v22  ;;  %v145_v34 = vadd.s32 %v143_v30, %v137_v21  ;;  %vm146_vm8 = vc.u32 %v144_v25, %v140_v24 }
  0xaa   :  { %v169_v37 = vsel %vm168_vm7, 1, %v1219_v27  ;;  %v147_v39 = vsel %vm146_vm8, 1, %v1219_v27  ;;  %v170_v59 = vadd.s32 %v166_v23, %v162_v22  ;;  %v664_v16 = vmul.f32 %v663_v14, %v1245_v0 }
  0xab   :  { %v171_v41 = vadd.s32 %v169_v37, %v167_v31  ;;  %v149_v48 = vadd.s32 %v147_v39, %v145_v34  ;;  %v681_v17 = vstv %s1121_s30  ;;  %v670_v22 = vstv %s1119_s3  ;;  %s1135_s30 = sld [smem:[#allocation2 + $0x1b]] }
  0xac   :  { %666 = vrot.lane.b32.xlu2 %v664_v16, %s1209_s1  ;;  %v682_v21 = vmul.f32 %v681_v17, %v1245_v0  ;;  %v671_v25 = vmul.f32 %v670_v22, %v1245_v0  ;;  %v688_v28 = vstv %s1122_s4  ;;  %v720_v14 = vstv %s1130_s9  ;;  %s1129_s3 = sld [smem:[#allocation2 + $0x15]]  ;;  %s1223_s9 = smov 116  }
  0xad   :  { %v172_v51 = vadd.s32 %v171_v41, %v161_v40  ;;  %v150_v33 = vadd.s32 %v149_v48, %v139_v47  ;;  %v689_v31 = vmul.f32 %v688_v28, %v1245_v0  ;;  %v703_v48 = vmul.f32 %v702_v43, %v1245_v0  ;;  %s1137_s4 = sld [smem:[#allocation2 + $0x1d]] }
  0xae   :  { %684 = vrot.lane.b32.xlu0 %v682_v21, %s1211_s23  ;;  %v913_v43 = vstv %s1138_s16  ;;  %s1519_s23 = sld [smem:[#allocation2 + $0x20]] }
  0xaf   :  { %v173_v54 = vadd.s32 %v172_v51, %v163_v50  ;;  %v151_v57 = vadd.s32 %v150_v33, %v141_v52 }
  0xb1   :  { %v177_v60 = vadd.s32 1, %v173_v54  ;;  %vm176_vm9 = vc.u32 %v151_v57, %v170_v59  ;;  %v175_v7 = vadd.s32 %v170_v59, %v151_v57 }
  0xb3   :  { %v178_v55 = vsel %vm176_vm9, %v177_v60, %v173_v54 }
  0xb4   :  { %v179_v62 = vadd.s32 %v178_v55, %v174_v61  ;;  %673 = vrot.lane.b32.xlu2 %v671_v25, %s1212_s27 }
  0xb6   :  { %v180_v63 = vadd.s32 536870912, %v179_v62  ;;  %691 = vrot.lane.b32.xlu0 %v689_v31, %s1208_s17  ;;  %s1123_s17 = sld [smem:[#allocation2 + $0xf]] }
  0xb8   :  { %v181_v58 = vshrl.u32 %v180_v63, 30 }
  0xba   :  { %v182_v1 = vshll.u32 %v181_v58, 30  ;;  %v205_v26 = vsub.s32 4, %v181_v58 }
  0xbc   :  { %v183_v2 = vsub.s32 %v179_v62, %v182_v1  ;;  %v206_v50 = vsel %vm83_vm12, %v205_v26, %v181_v58 }
  0xbd   :  { %v208_v33 = vsel %vm1343_vm13, 0, %v206_v50  ;;  %v695_v50 = vstv %s1123_s17 }
  0xbe   :  { %vm184_vm10 = vcmp.lt.s32.totalorder %v183_v2, 0  ;;  %v185_v3 = vsub.s32 0, %v183_v2  ;;  %705 = vrot.lane.b32.xlu0 %v703_v48, %s1209_s1  ;;  %v225_v60 = vand.u32 3, %v208_v33  ;;  %s1150_s1 = sld [smem:[#allocation2 + $0x24]] }
  0xc0   :  { %v186_v4 = vsel %vm184_vm10, %v185_v3, %v183_v2  ;;  %vm227_vm14 = vcmp.eq.s32.totalorder %v225_v60, 0  ;;  %vm230_vm15 = vcmp.eq.s32.totalorder %v225_v60, 2  ;;  %vm226_vm0 = vcmp.lt.s32.totalorder %v225_v60, 2  ;;  %v607_v3 = vpop.permute.xlu2 %606 }
  0xc1   :  { %v187_v5 = vclz %v186_v4  ;;  %v601_v4 = vstv %s24_s6  ;;  %s1133_s6 = sld [smem:[#allocation2 + $0x19]] }
  0xc3   :  { %v1148_v6 = vadd.s32 4294967294, %v187_v5  ;;  %v602_v5 = vmul.f32 %v601_v4, %v1245_v0 }
  0xc5   :  { %vm1149_vm11 = vcmp.lt.s32.totalorder %v1148_v6, 0 }
  0xc6   :  { %v190_v35 = vsel %vm1149_vm11, 0, %v1148_v6  ;;  %v621_v6 = vpop.permute.xlu0 %620 }
  0xc7   :  { %v191_v8 = vsub.s32 32, %v190_v35  ;;  %v195_v9 = vsub.s32 4294967266, %v190_v35  ;;  %v192_v56 = vshll.u32 %v183_v2, %v190_v35  ;;  %v609_v35 = vadd.f32 %v607_v3, %v602_v5 }
  0xc9   :  { %v193_v10 = vshrl.u32 %v175_v7, %v191_v8  ;;  %v196_v11 = vadd.s32 127, %v195_v9  ;;  %v614_v7 = vpop.permute.xlu2 %613 }
  0xca   :  { %v616_v8 = vadd.f32 %v614_v7, %v609_v35 }
  0xcb   :  { %v194_v12 = vor.u32 %v193_v10, %v192_v56  ;;  %v197_v13 = vshll.u32 %v196_v11, 23  ;;  %v638_v11 = vstv %s1126_s8  ;;  %s1139_s8 = sld [smem:[#allocation2 + $0x1f]] }
  0xcc   :  { %v623_v56 = vadd.f32 %v621_v6, %v616_v8 }
  0xcd   :  { %v198_v15 = vor.u32 4788187, %v197_v13  ;;  %v201_v20 = vcvt.s32.f32 %v194_v12 }
  0xce   :  { %v628_v9 = vpop.permute.xlu0 %627 }
  0xcf   :  { %v199_v19 = vand.u32 2147483647, %v198_v15  ;;  %v630_v10 = vadd.f32 %v628_v9, %v623_v56 }
  0xd1   :  { %v202_v23 = vmul.f32 %v201_v20, %v199_v19  ;;  %v646_v15 = vpop.permute.xlu2 %645  ;;  %v640_v19 = vstv %s1114_s11 }
  0xd2   :  { %v641_v20 = vmul.f32 %v640_v19, %v1245_v0 }
  0xd3   :  { %v203_v24 = vxor.u32 2147483648, %v202_v23 }
  0xd4   :  { %v648_v22 = vadd.f32 %v646_v15, %v641_v20 }
  0xd5   :  { %v204_v30 = vsel %vm83_vm12, %v203_v24, %v202_v23 }
  0xd6   :  { %v207_v32 = vsel %vm1343_vm13, %v1260_v18, %v204_v30  ;;  %v635_v18 = vpop.permute.xlu0 %634 }
  0xd7   :  { %v209_v34 = vmul.f32 %v207_v32, %v207_v32  ;;  %v637_v12 = vadd.f32 %v635_v18, %v630_v10 }
  0xd9   :  { %v210_v37 = vmul.f32 -0.001358992, %v209_v34  ;;  %v217_v39 = vmul.f32 -0.00019511016, %v209_v34  ;;  %v1367_v13 = vadd.f32 %v638_v11, %v637_v12  ;;  %v653_v17 = vpop.permute.xlu2 %652  ;;  %v679_v11 = vstv %s1120_s21 }
  0xda   :  { %v655_v23 = vadd.f32 %v653_v17, %v648_v22  ;;  %v680_v19 = vmul.f32 %v679_v11, %v1245_v0 }
  0xdb   :  { %v211_v40 = vadd.f32 0.041655596, %v210_v37  ;;  %v218_v41 = vadd.f32 0.008332121, %v217_v39  ;;  %v721_v16 = vmul.f32 %v720_v14, %v1367_v13  ;;  %v709_v39 = vstv %s1125_s14 }
  0xdc   :  { %v710_v26 = vmul.f32 %v709_v39, %v1245_v0 }
  0xdd   :  { %v212_v45 = vmul.f32 %v211_v40, %v209_v34  ;;  %v219_v47 = vmul.f32 %v218_v41, %v209_v34  ;;  %723 = vrot.lane.b32.xlu0 %v721_v16, %s1221_s10  ;;  %v903_v40 = vstv %s1136_s15 }
  0xde   :  { %712 = vrot.lane.b32.xlu2 %v710_v26, %s1212_s27  ;;  %v904_v41 = vmul.f32 %v903_v40, %v1367_v13  ;;  %s1589_s27 = sld [smem:[#allocation2 + $0x2b]] }
  0xdf   :  { %v213_v51 = vadd.f32 -0.4999988, %v212_v45  ;;  %v220_v52 = vadd.f32 -0.16666654, %v219_v47 }
  0xe1   :  { %v214_v53 = vmul.f32 %v213_v51, %v209_v34  ;;  %v221_v54 = vmul.f32 %v220_v52, %v209_v34  ;;  %v660_v21 = vpop.permute.xlu2 %659  ;;  %v696_v51 = vmul.f32 %v695_v50, %v1245_v0  ;;  %v1222_v52 = vmov 13.0  }
  0xe2   :  { %v662_v25 = vadd.f32 %v660_v21, %v655_v23  ;;  %1187 = vrcp.f32 %v1222_v52 }
  0xe3   :  { %v215_v57 = vadd.f32 1.0, %v214_v53  ;;  %v222_v59 = vadd.f32 1.0, %v221_v54 }
  0xe4   :  { %s62_s29 = sadd.f32 %s1591_s28, %s1589_s27 }
  0xe5   :  { %v223_v61 = vmul.f32 %v222_v59, %v207_v32  ;;  %v231_v55 = vxor.u32 2147483648, %v215_v57  ;;  %v730_v32 = vstv %s1132_s13 }
  0xe6   :  { %906 = vrot.lane.b32.xlu2 %v904_v41, %s1221_s10 }
  0xe7   :  { %v228_v62 = vxor.u32 2147483648, %v223_v61  ;;  %v232_v58 = vsel %vm230_vm15, %v231_v55, %v223_v61  ;;  %v252_v61 = vstv %s1150_s1  ;;  %v412_v55 = vstv %s1155_s18 }
  0xe8   :  { %v1188_v33 = vpop.eup %1187 }
  0xe9   :  { %v229_v63 = vsel %vm227_vm14, %v215_v57, %v228_v62  ;;  %v244_v53 = vmul.f32 13.0, %v1188_v33  ;;  %vm248_vm3 = vweird.f32 %v1188_v33 }
  0xea   :  { %v233_v1 = vsel %vm226_vm0, %v229_v63, %v232_v58  ;;  %v255_v58 = vstv %s1151_s19 }
  0xeb   :  { %v1362_v2 = vsel %vm224_vm1, nan, %v233_v1  ;;  %v245_v54 = vsub.f32 1.0, %v244_v53  ;;  %v415_v1 = vstv %s1156_s20 }
  0xec   :  { %236 = vrot.lane.b32.xlu1 %v1362_v2, %s1220_s7 }
  0xed   :  { %v246_v57 = vmul.f32 %v1188_v33, %v245_v54 }
  0xef   :  { %v247_v59 = vadd.f32 %v1188_v33, %v246_v57 }
  0xf1   :  { %v249_v60 = vsel %vm248_vm3, %v1188_v33, %v247_v59 }
 0x106   :  { %v667_v24 = vpop.permute.xlu2 %666 }
 0x107   :  { %v669_v28 = vadd.f32 %v667_v24, %v662_v25 }
 0x10e   :  { %v674_v30 = vpop.permute.xlu2 %673 }
 0x10f   :  { %v676_v31 = vadd.f32 %v674_v30, %v669_v28 }
 0x111   :  { %v1372_v34 = vadd.f32 %v677_v29, %v676_v31 }
 0x113   :  { %v731_v37 = vmul.f32 %v730_v32, %v1372_v34  ;;  %v914_v45 = vmul.f32 %v913_v43, %v1372_v34 }
 0x115   :  { %733 = vrot.lane.b32.xlu0 %v731_v37, %s1221_s10  ;;  %916 = vrot.lane.b32.xlu2 %v914_v45, %s1221_s10 }
 0x120   :  { %v685_v24 = vpop.permute.xlu0 %684 }
 0x121   :  { %v1399_v29 = vadd.f32 %v685_v24, %v680_v19 }
 0x15e   :  { %v237_v47 = vpop.permute.xlu1 %236 }
 0x15f   :  { %v240_v48 = vsel %vm239_vm2, %v237_v47, 0.0 }
 0x160   :  { %241 = vadd.xlane.f32.xlu1 %v240_v48 }
 0x179   :  { %698 = vrot.lane.b32.xlu1 %v696_v51, %s1210_s0  ;;  %s1514_s0 = sld [smem:[#allocation2 + $0x1a]] }
 0x1d3   :  { %v242_v62 = vpop.xlane.xlu1 %241 }
 0x1d4   :  { %v250_v63 = vmul.f32 %v249_v60, %v242_v62 }
 0x1d6   :  { %v253_v3 = vmul.f32 %v252_v61, %v250_v63  ;;  %v413_v4 = vmul.f32 %v412_v55, %v250_v63 }
 0x1d8   :  { %v1384_v5 = vadd.f32 %v255_v58, %v253_v3  ;;  %v1386_v6 = vadd.f32 %v415_v1, %v413_v4 }
 0x1da   :  { %v257_v35 = vand.u32 2147483647, %v1384_v5  ;;  %v260_v7 = vand.u32 2139095040, %v1384_v5  ;;  %v417_v8 = vand.u32 2147483647, %v1386_v6  ;;  %v420_v9 = vand.u32 2139095040, %v1386_v6 }
 0x1dc   :  { %v261_v56 = vshrl.u32 %v260_v7, 23  ;;  %v264_v10 = vand.u32 8388607, %v257_v35  ;;  %v421_v18 = vshrl.u32 %v420_v9, 23  ;;  %v424_v15 = vand.u32 8388607, %v417_v8 }
 0x1de   :  { %v1152_v12 = vadd.s32 4294967169, %v261_v56  ;;  %v265_v14 = vor.u32 8388608, %v264_v10  ;;  %v1157_v16 = vadd.s32 4294967169, %v421_v18  ;;  %v425_v22 = vor.u32 8388608, %v424_v15 }
 0x1e0   :  { %v267_v17 = vadd.s32 1, %v1152_v12  ;;  %v427_v20 = vadd.s32 1, %v1157_v16  ;;  %v1397_v21 = vshll.u32 %v265_v14, 8  ;;  %v1404_v37 = vshll.u32 %v425_v22, 8 }
 0x1e2   :  { %vm268_vm4 = vcmp.gt.s32.totalorder %v267_v17, 0  ;;  %vm428_vm5 = vcmp.gt.s32.totalorder %v427_v20, 0  ;;  %v306_v31 = vand.u32 65535, %v1397_v21  ;;  %v307_v40 = vshrl.u32 %v1397_v21, 16 }
 0x1e3   :  { %v269_v23 = vsel %vm268_vm4, %v267_v17, 0  ;;  %v429_v28 = vsel %vm428_vm5, %v427_v20, 0 }
 0x1e4   :  { %v271_v25 = vand.u32 31, %v269_v23  ;;  %v1402_v32 = vand.u32 31, %v429_v28  ;;  %v1406_v0 = vshrl.u32 %v269_v23, 5  ;;  %v1451_v20 = vshrl.u32 %v429_v28, 5 }
 0x1e6   :  { %v272_v30 = vsub.s32 32, %v271_v25  ;;  %v274_v39 = vshll.u32 %v1216_v44, %v271_v25  ;;  %v277_v26 = vshll.u32 %v1217_v46, %v271_v25  ;;  %v280_v45 = vshll.u32 %v1218_v49, %v271_v25 }
 0x1e7   :  { %v283_v48 = vshll.u32 %v1213_v36, %v271_v25  ;;  %v286_v51 = vshll.u32 %v1214_v38, %v271_v25  ;;  %v1420_v57 = vsub.s32 32, %v1402_v32  ;;  %vm289_vm6 = vcmp.lt.s32.totalorder %v1406_v0, 1 }
 0x1e8   :  { %v275_v41 = vshrl.u32 %v1217_v46, %v272_v30  ;;  %v278_v43 = vshrl.u32 %v1218_v49, %v272_v30  ;;  %v281_v47 = vshrl.u32 %v1213_v36, %v272_v30  ;;  %v284_v50 = vshrl.u32 %v1214_v38, %v272_v30 }
 0x1e9   :  { %v287_v52 = vshrl.u32 %v1215_v42, %v272_v30  ;;  %vm290_vm7 = vcmp.lt.s32.totalorder %v1406_v0, 2  ;;  %v273_v61 = vshrl.u32 %v1216_v44, %v272_v30  ;;  %vm292_vm8 = vcmp.lt.s32.totalorder %v1406_v0, 4 }
 0x1ea   :  { %v276_v33 = vor.u32 %v275_v41, %v274_v39  ;;  %v279_v53 = vor.u32 %v278_v43, %v277_v26  ;;  %v282_v54 = vor.u32 %v281_v47, %v280_v45  ;;  %v285_v59 = vor.u32 %v284_v50, %v283_v48 }
 0x1eb   :  { %v288_v60 = vor.u32 %v287_v52, %v286_v51  ;;  %vm291_vm9 = vcmp.lt.s32.totalorder %v1406_v0, 3  ;;  %v434_v1 = vshll.u32 %v1216_v44, %v1402_v32  ;;  %v435_v9 = vshrl.u32 %v1217_v46, %v1420_v57 }
 0x1ec   :  { %v297_v55 = vsel %vm289_vm6, %v276_v33, %v279_v53  ;;  %v301_v62 = vsel %vm289_vm6, %v279_v53, %v282_v54  ;;  %v298_v63 = vsel %vm292_vm8, %v285_v59, 920167782  ;;  %v294_v3 = vsel %vm292_vm8, %v282_v54, 2102212464 }
 0x1ed   :  { %v302_v58 = vsel %vm292_vm8, %v288_v60, 1326507024  ;;  %v299_v4 = vsel %vm291_vm9, %v282_v54, %v298_v63  ;;  %v437_v18 = vshll.u32 %v1217_v46, %v1402_v32  ;;  %v438_v11 = vshrl.u32 %v1218_v49, %v1420_v57 }
 0x1ee   :  { %v303_v7 = vsel %vm291_vm9, %v285_v59, %v302_v58  ;;  %v300_v56 = vsel %vm290_vm7, %v297_v55, %v299_v4  ;;  %v293_v17 = vsel %vm289_vm6, %v273_v61, %v276_v33  ;;  %v295_v19 = vsel %vm291_vm9, %v279_v53, %v294_v3 }
 0x1ef   :  { %v304_v10 = vsel %vm290_vm7, %v301_v62, %v303_v7  ;;  %v330_v15 = vand.u32 65535, %v300_v56  ;;  %v331_v16 = vshrl.u32 %v300_v56, 16  ;;  %v1453_v22 = vor.u32 %v435_v9, %v434_v1 }
 0x1f0   :  { %v308_v12 = vand.u32 65535, %v304_v10  ;;  %v309_v14 = vshrl.u32 %v304_v10, 16  ;;  %v1455_v25 = vor.u32 %v438_v11, %v437_v18  ;;  %v441_v30 = vshrl.u32 %v1213_v36, %v1420_v57 }
 0x1f1   :  { %v333_v26 = vmul.u32 %v331_v16, %v306_v31  ;;  %v334_v41 = vmul.u32 %v330_v15, %v307_v40  ;;  %v440_v43 = vshll.u32 %v1218_v49, %v1402_v32  ;;  %v332_v48 = vmul.u32 %v330_v15, %v306_v31 }
 0x1f2   :  { %v311_v23 = vmul.u32 %v309_v14, %v306_v31  ;;  %v312_v24 = vmul.u32 %v308_v12, %v307_v40  ;;  %v310_v39 = vmul.u32 %v308_v12, %v306_v31  ;;  %v313_v45 = vmul.u32 %v309_v14, %v307_v40 }
 0x1f3   :  { %v335_v28 = vmul.u32 %v331_v16, %v307_v40  ;;  %v336_v33 = vshll.u32 %v333_v26, 16  ;;  %v338_v54 = vshll.u32 %v334_v41, 16  ;;  %v442_v59 = vor.u32 %v441_v30, %v440_v43 }
 0x1f4   :  { %v314_v47 = vshll.u32 %v311_v23, 16  ;;  %v315_v50 = vshrl.u32 %v311_v23, 16  ;;  %v316_v51 = vshll.u32 %v312_v24, 16  ;;  %v317_v52 = vshrl.u32 %v312_v24, 16 }
 0x1f5   :  { %vm340_vm11 = vc.u32 %v332_v48, %v336_v33  ;;  %v342_v61 = vadd.s32 %v336_v33, %v332_v48  ;;  %v444_v55 = vshrl.u32 %v1214_v38, %v1420_v57  ;;  %v443_v40 = vshll.u32 %v1213_v36, %v1402_v32 }
 0x1f6   :  { %vm318_vm10 = vc.u32 %v310_v39, %v314_v47  ;;  %v320_v53 = vadd.s32 %v314_v47, %v310_v39  ;;  %v341_v31 = vsel %vm340_vm11, 1, %v1219_v27  ;;  %v446_v1 = vshll.u32 %v1214_v38, %v1402_v32 }
 0x1f7   :  { %v319_v60 = vsel %vm318_vm10, 1, %v1219_v27  ;;  %v343_v58 = vadd.s32 %v341_v31, %v335_v28  ;;  %vm344_vm13 = vc.u32 %v342_v61, %v338_v54  ;;  %v445_v7 = vor.u32 %v444_v55, %v443_v40 }
 0x1f8   :  { %v321_v62 = vadd.s32 %v319_v60, %v313_v45  ;;  %vm322_vm12 = vc.u32 %v320_v53, %v316_v51  ;;  %v345_v4 = vsel %vm344_vm13, 1, %v1219_v27  ;;  %v447_v9 = vshrl.u32 %v1215_v42, %v1420_v57 }
 0x1f9   :  { %v323_v63 = vsel %vm322_vm12, 1, %v1219_v27  ;;  %v337_v56 = vshrl.u32 %v333_v26, 16  ;;  %v339_v10 = vshrl.u32 %v334_v41, 16  ;;  %v1473_v18 = vadd.s32 %v342_v61, %v338_v54 }
 0x1fa   :  { %v325_v3 = vadd.s32 %v323_v63, %v321_v62  ;;  %v347_v11 = vadd.s32 %v345_v4, %v343_v58  ;;  %v448_v14 = vor.u32 %v447_v9, %v446_v1  ;;  %vm449_vm14 = vcmp.lt.s32.totalorder %v1451_v20, 1 }
 0x1fb   :  { %vm452_vm15 = vcmp.lt.s32.totalorder %v1451_v20, 4  ;;  %vm451_vm0 = vcmp.lt.s32.totalorder %v1451_v20, 3  ;;  %v457_v32 = vsel %vm449_vm14, %v1453_v22, %v1455_v25  ;;  %vm450_vm1 = vcmp.lt.s32.totalorder %v1451_v20, 2 }
 0x1fc   :  { %v326_v12 = vadd.s32 %v325_v3, %v315_v50  ;;  %v348_v15 = vadd.s32 %v347_v11, %v337_v56  ;;  %v458_v16 = vsel %vm452_vm15, %v445_v7, 920167782  ;;  %v461_v30 = vsel %vm449_vm14, %v1455_v25, %v442_v59  ;;  %v692_v50 = vpop.permute.xlu0 %691 }
 0x1fd   :  { %v459_v24 = vsel %vm451_vm0, %v442_v59, %v458_v16  ;;  %v296_v39 = vsel %vm290_vm7, %v293_v17, %v295_v19  ;;  %v462_v43 = vsel %vm452_vm15, %v448_v14, 1326507024  ;;  %v466_v47 = vand.u32 65535, %v1404_v37 }
 0x1fe   :  { %v1484_v23 = vadd.s32 %v326_v12, %v317_v52  ;;  %v349_v26 = vadd.s32 %v348_v15, %v339_v10  ;;  %v460_v41 = vsel %vm450_vm1, %v457_v32, %v459_v24  ;;  %v463_v45 = vsel %vm451_vm0, %v445_v7, %v462_v43  ;;  %v699_v12 = vpop.permute.xlu1 %698 }
 0x1ff   :  { %v490_v48 = vand.u32 65535, %v460_v41  ;;  %v464_v0 = vsel %vm450_vm1, %v461_v30, %v463_v45  ;;  %v467_v17 = vshrl.u32 %v1404_v37, 16  ;;  %v491_v19 = vshrl.u32 %v460_v41, 16 }
 0x200   :  { %vm352_vm2 = vc.u32 %v1484_v23, %v1473_v18  ;;  %v353_v28 = vadd.s32 1, %v349_v26  ;;  %v350_v51 = vmul.u32 %v1397_v21, %v296_v39  ;;  %v468_v52 = vand.u32 65535, %v464_v0 }
 0x201   :  { %v469_v33 = vshrl.u32 %v464_v0, 16  ;;  %v694_v53 = vadd.f32 %v692_v50, %v1399_v29  ;;  %v493_v60 = vmul.u32 %v491_v19, %v466_v47  ;;  %v494_v61 = vmul.u32 %v490_v48, %v467_v17 }
 0x202   :  { %v354_v54 = vsel %vm352_vm2, %v353_v28, %v349_v26  ;;  %v433_v62 = vshrl.u32 %v1216_v44, %v1420_v57  ;;  %v472_v40 = vmul.u32 %v468_v52, %v467_v17  ;;  %v454_v63 = vsel %vm452_vm15, %v442_v59, 2102212464 }
 0x203   :  { %v355_v55 = vadd.s32 %v354_v54, %v350_v51  ;;  %v471_v31 = vmul.u32 %v469_v33, %v466_v47  ;;  %v492_v58 = vmul.u32 %v490_v48, %v466_v47  ;;  %v495_v1 = vmul.u32 %v491_v19, %v467_v17 }
 0x204   :  { %v496_v3 = vshll.u32 %v493_v60, 16  ;;  %v470_v4 = vmul.u32 %v468_v52, %v466_v47  ;;  %v473_v7 = vmul.u32 %v469_v33, %v467_v17  ;;  %v476_v29 = vshll.u32 %v472_v40, 16  ;;  %v706_v43 = vpop.permute.xlu0 %705  ;;  %v713_v17 = vpop.permute.xlu2 %712 }
 0x205   :  { %v356_v21 = vadd.s32 536870912, %v355_v55  ;;  %v474_v9 = vshll.u32 %v471_v31, 16  ;;  %v498_v56 = vshll.u32 %v494_v61, 16  ;;  %v453_v14 = vsel %vm449_vm14, %v433_v62, %v1453_v22 }
 0x206   :  { %vm500_vm3 = vc.u32 %v492_v58, %v496_v3  ;;  %v502_v10 = vadd.s32 %v496_v3, %v492_v58  ;;  %v455_v24 = vsel %vm451_vm0, %v1455_v25, %v454_v63  ;;  %v701_v41 = vadd.f32 %v699_v12, %v694_v53 }
 0x207   :  { %v1516_v57 = vshrl.u32 %v356_v21, 30  ;;  %vm478_vm4 = vc.u32 %v470_v4, %v474_v9  ;;  %v480_v11 = vadd.s32 %v474_v9, %v470_v4  ;;  %v501_v59 = vsel %vm500_vm3, 1, %v1219_v27 }
 0x208   :  { %v479_v15 = vsel %vm478_vm4, 1, %v1219_v27  ;;  %v503_v32 = vadd.s32 %v501_v59, %v495_v1  ;;  %vm504_vm5 = vc.u32 %v502_v10, %v498_v56  ;;  %v475_v45 = vshrl.u32 %v471_v31, 16 }
 0x209   :  { %v358_v16 = vshll.u32 %v1516_v57, 30  ;;  %v481_v30 = vadd.s32 %v479_v15, %v473_v7  ;;  %vm482_vm6 = vc.u32 %v480_v11, %v476_v29  ;;  %v505_v26 = vsel %vm504_vm5, 1, %v1219_v27 }
 0x20a   :  { %v483_v39 = vsel %vm482_vm6, 1, %v1219_v27  ;;  %v507_v48 = vadd.s32 %v505_v26, %v503_v32  ;;  %v456_v28 = vsel %vm450_vm1, %v453_v14, %v455_v24  ;;  %v497_v0 = vshrl.u32 %v493_v60, 16 }
 0x20b   :  { %v359_v22 = vsub.s32 %v355_v55, %v358_v16  ;;  %v485_v47 = vadd.s32 %v483_v39, %v481_v30  ;;  %v708_v25 = vadd.f32 %v706_v43, %v701_v41  ;;  %v716_v51 = vstv %s1512_s22 }
 0x20c   :  { %v477_v52 = vshrl.u32 %v472_v40, 16  ;;  %v499_v33 = vshrl.u32 %v494_v61, 16  ;;  %v508_v53 = vadd.s32 %v507_v48, %v497_v0  ;;  %v506_v62 = vadd.s32 %v502_v10, %v498_v56 }
 0x20d   :  { %vm360_vm7 = vcmp.lt.s32.totalorder %v359_v22, 0  ;;  %v361_v19 = vsub.s32 0, %v359_v22  ;;  %v486_v50 = vadd.s32 %v485_v47, %v475_v45  ;;  %v715_v54 = vadd.f32 %v713_v17, %v708_v25 }
 0x20e   :  { %v740_v31 = vstv %s1514_s0  ;;  %v923_v63 = vstv %s1519_s23  ;;  %v509_v20 = vadd.s32 %v508_v53, %v499_v33  ;;  %v510_v4 = vmul.u32 %v1404_v37, %v456_v28 }
 0x20f   :  { %v362_v55 = vsel %vm360_vm7, %v361_v19, %v359_v22  ;;  %v487_v1 = vadd.s32 %v486_v50, %v477_v52  ;;  %v1536_v3 = vadd.f32 %v716_v51, %v715_v54  ;;  %v351_v56 = vadd.s32 %v1473_v18, %v1484_v23 }
 0x210   :  { %v363_v58 = vclz %v362_v55  ;;  %v513_v21 = vadd.s32 1, %v509_v20  ;;  %vm259_vm11 = vcmp.lt.s32.totalorder %v1384_v5, 0  ;;  %vm1551_vm12 = vcmp.le.f32.partialorder %v257_v35, 0.7853982 }
 0x211   :  { %vm512_vm8 = vc.u32 %v487_v1, %v506_v62  ;;  %v741_v7 = vmul.f32 %v740_v31, %v1536_v3  ;;  %v924_v61 = vmul.f32 %v923_v63, %v1536_v3  ;;  %v511_v50 = vadd.s32 %v506_v62, %v487_v1 }
 0x212   :  { %v1153_v60 = vadd.s32 4294967294, %v363_v58  ;;  %v514_v40 = vsel %vm512_vm8, %v513_v21, %v509_v20  ;;  %v381_v62 = vsub.s32 4, %v1516_v57  ;;  %vm419_vm14 = vcmp.lt.s32.totalorder %v1386_v6, 0 }
 0x213   :  { %v515_v29 = vadd.s32 %v514_v40, %v510_v4  ;;  %743 = vrot.lane.b32.xlu1 %v741_v7, %s1221_s10  ;;  %926 = vrot.lane.b32.xlu0 %v924_v61, %s1221_s10  ;;  %vm1564_vm15 = vcmp.le.f32.partialorder %v417_v8, 0.7853982  ;;  %vm400_vm3 = vweird.f32 %v1384_v5  ;;  %vm560_vm7 = vweird.f32 %v1386_v6 }
 0x214   :  { %vm1154_vm9 = vcmp.lt.s32.totalorder %v1153_v60, 0 }
 0x215   :  { %v366_v9 = vsel %vm1154_vm9, 0, %v1153_v60  ;;  %v516_v59 = vadd.s32 536870912, %v515_v29 }
 0x216   :  { %v367_v10 = vsub.s32 32, %v366_v9  ;;  %v371_v11 = vsub.s32 4294967266, %v366_v9  ;;  %v368_v12 = vshll.u32 %v359_v22, %v366_v9 }
 0x217   :  { %v1545_v15 = vshrl.u32 %v516_v59, 30  ;;  %v382_v59 = vsel %vm259_vm11, %v381_v62, %v1516_v57 }
 0x218   :  { %v369_v37 = vshrl.u32 %v351_v56, %v367_v10  ;;  %v372_v14 = vadd.s32 127, %v371_v11 }
 0x219   :  { %v518_v24 = vshll.u32 %v1545_v15, 30 }
 0x21a   :  { %v370_v32 = vor.u32 %v369_v37, %v368_v12  ;;  %v373_v16 = vshll.u32 %v372_v14, 23 }
 0x21b   :  { %v519_v39 = vsub.s32 %v515_v29, %v518_v24 }
 0x21c   :  { %v374_v30 = vor.u32 4788187, %v373_v16  ;;  %v377_v41 = vcvt.s32.f32 %v370_v32  ;;  %v384_v32 = vsel %vm1551_vm12, 0, %v382_v59 }
 0x21d   :  { %vm520_vm10 = vcmp.lt.s32.totalorder %v519_v39, 0  ;;  %v521_v43 = vsub.s32 0, %v519_v39 }
 0x21e   :  { %v375_v26 = vand.u32 2147483647, %v374_v30  ;;  %v541_v30 = vsub.s32 4, %v1545_v15 }
 0x21f   :  { %v522_v18 = vsel %vm520_vm10, %v521_v43, %v519_v39  ;;  %v401_v43 = vand.u32 3, %v384_v32  ;;  %v1089_v32 = vstv %s62_s29 }
 0x220   :  { %v378_v45 = vmul.f32 %v377_v41, %v375_v26  ;;  %v523_v47 = vclz %v522_v18 }
 0x221   :  { %vm403_vm0 = vcmp.eq.s32.totalorder %v401_v43, 0  ;;  %vm406_vm1 = vcmp.eq.s32.totalorder %v401_v43, 2  ;;  %vm402_vm2 = vcmp.lt.s32.totalorder %v401_v43, 2 }
 0x222   :  { %v379_v23 = vxor.u32 2147483648, %v378_v45  ;;  %v1158_v28 = vadd.s32 4294967294, %v523_v47 }
 0x224   :  { %v380_v48 = vsel %vm259_vm11, %v379_v23, %v378_v45  ;;  %vm1159_vm13 = vcmp.lt.s32.totalorder %v1158_v28, 0  ;;  %v542_v23 = vsel %vm419_vm14, %v541_v30, %v1545_v15  ;;  %v718_v30 = vstv %s1129_s3 }
 0x225   :  { %v383_v0 = vsel %vm1551_vm12, %v1384_v5, %v380_v48  ;;  %v526_v17 = vsel %vm1159_vm13, 0, %v1158_v28  ;;  %v719_v43 = vmul.f32 %v718_v30, %v1367_v13 }
 0x226   :  { %v385_v25 = vmul.f32 %v383_v0, %v383_v0  ;;  %v527_v51 = vsub.s32 32, %v526_v17  ;;  %v531_v33 = vsub.s32 4294967266, %v526_v17  ;;  %v528_v54 = vshll.u32 %v519_v39, %v526_v17 }
 0x228   :  { %v393_v19 = vmul.f32 -0.00019511016, %v385_v25  ;;  %v386_v52 = vmul.f32 -0.001358992, %v385_v25  ;;  %v529_v53 = vshrl.u32 %v511_v50, %v527_v51  ;;  %v532_v55 = vadd.s32 127, %v531_v33 }
 0x22a   :  { %v394_v35 = vadd.f32 0.008332121, %v393_v19  ;;  %v387_v63 = vadd.f32 0.041655596, %v386_v52  ;;  %v530_v58 = vor.u32 %v529_v53, %v528_v54  ;;  %v533_v20 = vshll.u32 %v532_v55, 23 }
 0x22b   :  { %v572_v53 = vstv %s1579_s24 }
 0x22c   :  { %v395_v31 = vmul.f32 %v394_v35, %v385_v25  ;;  %v534_v21 = vor.u32 4788187, %v533_v20  ;;  %v388_v4 = vmul.f32 %v387_v63, %v385_v25  ;;  %v537_v61 = vcvt.s32.f32 %v530_v58 }
 0x22e   :  { %v396_v60 = vadd.f32 -0.16666654, %v395_v31  ;;  %v535_v7 = vand.u32 2147483647, %v534_v21  ;;  %v389_v1 = vadd.f32 -0.4999988, %v388_v4  ;;  %v575_v31 = vstv %s1161_s25 }
 0x230   :  { %v397_v40 = vmul.f32 %v396_v60, %v385_v25  ;;  %v538_v9 = vmul.f32 %v537_v61, %v535_v7  ;;  %v390_v37 = vmul.f32 %v389_v1, %v385_v25  ;;  %v579_v7 = vstv %s1162_s26 }
 0x232   :  { %v539_v29 = vxor.u32 2147483648, %v538_v9  ;;  %v398_v56 = vadd.f32 1.0, %v397_v40  ;;  %v391_v39 = vadd.f32 1.0, %v390_v37 }
 0x234   :  { %v540_v11 = vsel %vm419_vm14, %v539_v29, %v538_v9  ;;  %v399_v8 = vmul.f32 %v398_v56, %v383_v0  ;;  %v407_v47 = vxor.u32 2147483648, %v391_v39  ;;  %v544_v0 = vsel %vm1564_vm15, 0, %v542_v23 }
 0x235   :  { %v543_v12 = vsel %vm1564_vm15, %v1386_v6, %v540_v11  ;;  %v561_v33 = vand.u32 3, %v544_v0 }
 0x236   :  { %v545_v14 = vmul.f32 %v543_v12, %v543_v12  ;;  %v404_v45 = vxor.u32 2147483648, %v399_v8  ;;  %v408_v19 = vsel %vm406_vm1, %v407_v47, %v399_v8 }
 0x237   :  { %vm563_vm4 = vcmp.eq.s32.totalorder %v561_v33, 0  ;;  %vm566_vm5 = vcmp.eq.s32.totalorder %v561_v33, 2  ;;  %vm562_vm6 = vcmp.lt.s32.totalorder %v561_v33, 2 }
 0x238   :  { %v546_v16 = vmul.f32 -0.001358992, %v545_v14  ;;  %v553_v24 = vmul.f32 -0.00019511016, %v545_v14  ;;  %v405_v28 = vsel %vm403_vm0, %v391_v39, %v404_v45  ;;  %v724_v39 = vpop.permute.xlu0 %723  ;;  %v910_v45 = vstv %s1137_s4 }
 0x239   :  { %v409_v52 = vsel %vm402_vm2, %v405_v28, %v408_v19  ;;  %v726_v23 = vadd.f32 %v724_v39, %v719_v43  ;;  %v920_v28 = vstv %s1139_s8 }
 0x23a   :  { %v547_v26 = vadd.f32 0.041655596, %v546_v16  ;;  %v554_v41 = vadd.f32 0.008332121, %v553_v24  ;;  %v410_v54 = vsel %vm400_vm3, nan, %v409_v52  ;;  %v901_v24 = vstv %s1135_s30 }
 0x23b   :  { %v573_v60 = vmul.f32 %v572_v53, %v410_v54 }
 0x23c   :  { %v548_v57 = vmul.f32 %v547_v26, %v545_v14  ;;  %v555_v18 = vmul.f32 %v554_v41, %v545_v14  ;;  %v907_v26 = vpop.permute.xlu2 %906  ;;  %v902_v41 = vmul.f32 %v901_v24, %v1367_v13 }
 0x23e   :  { %v549_v22 = vadd.f32 -0.4999988, %v548_v57  ;;  %v556_v48 = vadd.f32 -0.16666654, %v555_v18  ;;  %v727_v57 = vstv %s1131_s5  ;;  %v909_v18 = vadd.f32 %v907_v26, %v902_v41 }
 0x23f   :  { %v728_v47 = vmul.f32 %v727_v57, %v1372_v34 }
 0x240   :  { %v550_v25 = vmul.f32 %v549_v22, %v545_v14  ;;  %v557_v17 = vmul.f32 %v556_v48, %v545_v14  ;;  %v734_v22 = vpop.permute.xlu0 %733  ;;  %v737_v48 = vstv %s1133_s6 }
 0x241   :  { %v738_v19 = vmul.f32 %v737_v48, %v1536_v3 }
 0x242   :  { %v551_v50 = vadd.f32 1.0, %v550_v25  ;;  %v558_v51 = vadd.f32 1.0, %v557_v17  ;;  %v729_v25 = vadd.f32 %v728_v47, %v726_v23 }
 0x244   :  { %v559_v15 = vmul.f32 %v558_v51, %v543_v12  ;;  %v567_v35 = vxor.u32 2147483648, %v551_v50  ;;  %v917_v17 = vpop.permute.xlu2 %916  ;;  %v736_v13 = vadd.f32 %v734_v22, %v729_v25 }
 0x246   :  { %v564_v55 = vxor.u32 2147483648, %v559_v15  ;;  %v568_v58 = vsel %vm566_vm5, %v567_v35, %v559_v15  ;;  %v739_v52 = vadd.f32 %v738_v19, %v736_v13 }
 0x248   :  { %v565_v63 = vsel %vm563_vm4, %v551_v50, %v564_v55  ;;  %v921_v50 = vmul.f32 %v920_v28, %v1536_v3 }
 0x249   :  { %v569_v20 = vsel %vm562_vm6, %v565_v63, %v568_v58 }
 0x24a   :  { %v570_v21 = vsel %vm560_vm7, nan, %v569_v20 }
 0x24b   :  { %v576_v4 = vmul.f32 %v575_v31, %v570_v21 }
 0x24d   :  { %v577_v61 = vadd.f32 %v576_v4, %v573_v60 }
 0x24f   :  { %v580_v40 = vadd.f32 %v579_v7, %v577_v61 }
 0x251   :  { %v1163_v9 = vmul.f32 -1.442695, %v580_v40 }
 0x253   :  { %1189 = vpow2.f32 %v1163_v9 }
 0x259   :  { %v1190_v5 = vpop.eup %1189 }
 0x25a   :  { %v584_v62 = vadd.f32 1.0, %v1190_v5 }
 0x25c   :  { %1191 = vrcp.f32 %v584_v62  ;;  %v596_v56 = vand.u32 2147483648, %v584_v62  ;;  %v594_v11 = vand.u32 2147483647, %v584_v62  ;;  %vm590_vm9 = vweird.f32 %v584_v62 }
 0x25e   :  { %v597_v12 = vor.u32 1.1754944e-38, %v596_v56  ;;  %vm595_vm11 = vcmp.eq.f32.partialorder %v594_v11, 8.507059e+37 }
 0x262   :  { %v1192_v1 = vpop.eup %1191 }
 0x263   :  { %v586_v6 = vmul.f32 %v1192_v1, %v584_v62  ;;  %vm591_vm8 = vweird.f32 %v1192_v1 }
 0x264   :  { %vm592_vm10 = vmor %vm590_vm9, %vm591_vm8 }
 0x265   :  { %v587_v29 = vsub.f32 1.0, %v586_v6 }
 0x267   :  { %v588_v10 = vmul.f32 %v1192_v1, %v587_v29 }
 0x269   :  { %v589_v59 = vadd.f32 %v1192_v1, %v588_v10 }
 0x26b   :  { %v593_v37 = vsel %vm592_vm10, %v1192_v1, %v589_v59 }
 0x26c   :  { %v598_v14 = vsel %vm595_vm11, %v597_v12, %v593_v37 }
 0x26d   :  { %v600_v8 = vmul.f32 %v598_v14, %v1362_v2  ;;  %v911_v2 = vmul.f32 %v910_v45, %v1372_v34 }
 0x26f   :  { %v1090_v16 = vmul.f32 %v1089_v32, %v600_v8  ;;  %v912_v0 = vadd.f32 %v911_v2, %v909_v18 }
 0x271   :  { %1092 = vrot.lane.b32.xlu2 %v1090_v16, %s1220_s7  ;;  %v919_v51 = vadd.f32 %v917_v17, %v912_v0  ;;  %s1146_s7 = sld [smem:[#allocation2 + $0x2d]] }
 0x273   :  { %v922_v33 = vadd.f32 %v921_v50, %v919_v51 }
 0x285   :  { %v744_v15 = vpop.permute.xlu1 %743  ;;  %v927_v35 = vpop.permute.xlu0 %926 }
 0x286   :  { %v1603_v53 = vadd.f32 %v744_v15, %v739_v52  ;;  %v1605_v54 = vadd.f32 %v927_v35, %v922_v33 }
 0x288   :  { %v747_v34 = vand.u32 2147483647, %v1603_v53  ;;  %v750_v55 = vand.u32 2139095040, %v1603_v53  ;;  %v930_v31 = vand.u32 2147483647, %v1605_v54  ;;  %v933_v63 = vand.u32 2139095040, %v1605_v54 }
 0x28a   :  { %v751_v58 = vshrl.u32 %v750_v55, 23  ;;  %v754_v3 = vand.u32 8388607, %v747_v34  ;;  %v934_v20 = vshrl.u32 %v933_v63, 23  ;;  %v937_v4 = vand.u32 8388607, %v930_v31 }
 0x28c   :  { %v1164_v60 = vadd.s32 4294967169, %v751_v58  ;;  %v755_v21 = vor.u32 8388608, %v754_v3  ;;  %v1167_v7 = vadd.s32 4294967169, %v934_v20  ;;  %v938_v5 = vor.u32 8388608, %v937_v4 }
 0x28e   :  { %v757_v61 = vadd.s32 1, %v1164_v60  ;;  %v940_v40 = vadd.s32 1, %v1167_v7  ;;  %v1615_v9 = vshll.u32 %v755_v21, 8  ;;  %v1620_v11 = vshll.u32 %v938_v5, 8 }
 0x290   :  { %vm758_vm12 = vcmp.gt.s32.totalorder %v757_v61, 0  ;;  %vm941_vm13 = vcmp.gt.s32.totalorder %v940_v40, 0  ;;  %v796_v56 = vand.u32 65535, %v1615_v9  ;;  %v797_v14 = vshrl.u32 %v1615_v9, 16 }
 0x291   :  { %v759_v62 = vsel %vm758_vm12, %v757_v61, 0  ;;  %v942_v6 = vsel %vm941_vm13, %v940_v40, 0 }
 0x292   :  { %v761_v1 = vand.u32 31, %v759_v62  ;;  %v1618_v10 = vand.u32 31, %v942_v6  ;;  %v1622_v59 = vshrl.u32 %v759_v62, 5  ;;  %v1667_v60 = vshrl.u32 %v942_v6, 5 }
 0x294   :  { %v762_v29 = vsub.s32 32, %v761_v1  ;;  %v764_v12 = vshll.u32 %v1216_v44, %v761_v1  ;;  %v767_v37 = vshll.u32 %v1217_v46, %v761_v1  ;;  %v770_v16 = vshll.u32 %v1218_v49, %v761_v1 }
 0x295   :  { %v773_v30 = vshll.u32 %v1213_v36, %v761_v1  ;;  %v776_v26 = vshll.u32 %v1214_v38, %v761_v1  ;;  %v1636_v18 = vsub.s32 32, %v1618_v10  ;;  %vm779_vm14 = vcmp.lt.s32.totalorder %v1622_v59, 1 }
 0x296   :  { %v765_v32 = vshrl.u32 %v1217_v46, %v762_v29  ;;  %v768_v8 = vshrl.u32 %v1218_v49, %v762_v29  ;;  %v771_v24 = vshrl.u32 %v1213_v36, %v762_v29  ;;  %v774_v39 = vshrl.u32 %v1214_v38, %v762_v29 }
 0x297   :  { %v777_v41 = vshrl.u32 %v1215_v42, %v762_v29  ;;  %vm780_vm15 = vcmp.lt.s32.totalorder %v1622_v59, 2  ;;  %v763_v47 = vshrl.u32 %v1216_v44, %v762_v29  ;;  %vm782_vm0 = vcmp.lt.s32.totalorder %v1622_v59, 4 }
 0x298   :  { %v766_v43 = vor.u32 %v765_v32, %v764_v12  ;;  %v769_v45 = vor.u32 %v768_v8, %v767_v37  ;;  %v772_v57 = vor.u32 %v771_v24, %v770_v16  ;;  %v775_v23 = vor.u32 %v774_v39, %v773_v30 }
 0x299   :  { %v778_v2 = vor.u32 %v777_v41, %v776_v26  ;;  %vm781_vm1 = vcmp.lt.s32.totalorder %v1622_v59, 3  ;;  %v947_v25 = vshll.u32 %v1216_v44, %v1618_v10  ;;  %v948_v51 = vshrl.u32 %v1217_v46, %v1636_v18 }
 0x29a   :  { %v787_v22 = vsel %vm779_vm14, %v766_v43, %v769_v45  ;;  %v791_v48 = vsel %vm779_vm14, %v769_v45, %v772_v57  ;;  %v788_v28 = vsel %vm782_vm0, %v775_v23, 920167782  ;;  %v784_v17 = vsel %vm782_vm0, %v772_v57, 2102212464 }
 0x29b   :  { %v792_v0 = vsel %vm782_vm0, %v778_v2, 1326507024  ;;  %v789_v19 = vsel %vm781_vm1, %v772_v57, %v788_v28  ;;  %v950_v33 = vshll.u32 %v1217_v46, %v1618_v10  ;;  %v951_v15 = vshrl.u32 %v1218_v49, %v1636_v18 }
 0x29c   :  { %v793_v50 = vsel %vm781_vm1, %v775_v23, %v792_v0  ;;  %v790_v13 = vsel %vm780_vm15, %v787_v22, %v789_v19  ;;  %v783_v3 = vsel %vm779_vm14, %v763_v47, %v766_v43  ;;  %v785_v20 = vsel %vm781_vm1, %v769_v45, %v784_v17 }
 0x29d   :  { %v794_v52 = vsel %vm780_vm15, %v791_v48, %v793_v50  ;;  %v820_v63 = vand.u32 65535, %v790_v13  ;;  %v821_v58 = vshrl.u32 %v790_v13, 16  ;;  %v1669_v21 = vor.u32 %v948_v51, %v947_v25 }
 0x29e   :  { %v798_v35 = vand.u32 65535, %v794_v52  ;;  %v799_v55 = vshrl.u32 %v794_v52, 16  ;;  %v1671_v46 = vor.u32 %v951_v15, %v950_v33  ;;  %v954_v61 = vshrl.u32 %v1213_v36, %v1636_v18 }
 0x29f   :  { %v823_v5 = vmul.u32 %v821_v58, %v796_v56  ;;  %v824_v62 = vmul.u32 %v820_v63, %v797_v14  ;;  %v953_v1 = vshll.u32 %v1218_v49, %v1618_v10  ;;  %v822_v37 = vmul.u32 %v820_v63, %v796_v56 }
 0x2a0   :  { %v801_v4 = vmul.u32 %v799_v55, %v796_v56  ;;  %v802_v7 = vmul.u32 %v798_v35, %v797_v14  ;;  %v800_v40 = vmul.u32 %v798_v35, %v796_v56  ;;  %v803_v29 = vmul.u32 %v799_v55, %v797_v14 }
 0x2a1   :  { %v825_v6 = vmul.u32 %v821_v58, %v797_v14  ;;  %v826_v24 = vshll.u32 %v823_v5, 16  ;;  %v828_v39 = vshll.u32 %v824_v62, 16  ;;  %v1677_v26 = vor.u32 %v954_v61, %v953_v1 }
 0x2a2   :  { %v804_v12 = vshll.u32 %v801_v4, 16  ;;  %v805_v32 = vshrl.u32 %v801_v4, 16  ;;  %v806_v8 = vshll.u32 %v802_v7, 16  ;;  %v807_v16 = vshrl.u32 %v802_v7, 16 }
 0x2a3   :  { %vm830_vm3 = vc.u32 %v822_v37, %v826_v24  ;;  %v832_v43 = vadd.s32 %v826_v24, %v822_v37  ;;  %v957_v49 = vshrl.u32 %v1214_v38, %v1636_v18  ;;  %v956_v14 = vshll.u32 %v1213_v36, %v1618_v10 }
 0x2a4   :  { %vm808_vm2 = vc.u32 %v800_v40, %v804_v12  ;;  %v810_v30 = vadd.s32 %v804_v12, %v800_v40  ;;  %v831_v56 = vsel %vm830_vm3, 1, %v1219_v27  ;;  %v959_v2 = vshll.u32 %v1214_v38, %v1618_v10 }
 0x2a5   :  { %v809_v41 = vsel %vm808_vm2, 1, %v1219_v27  ;;  %v833_v23 = vadd.s32 %v831_v56, %v825_v6  ;;  %vm834_vm5 = vc.u32 %v832_v43, %v828_v39  ;;  %v958_v48 = vor.u32 %v957_v49, %v956_v14 }
 0x2a6   :  { %v811_v45 = vadd.s32 %v809_v41, %v803_v29  ;;  %vm812_vm4 = vc.u32 %v810_v30, %v806_v8  ;;  %v835_v22 = vsel %vm834_vm5, 1, %v1219_v27  ;;  %v960_v28 = vshrl.u32 %v1215_v42, %v1636_v18 }
 0x2a7   :  { %v813_v57 = vsel %vm812_vm4, 1, %v1219_v27  ;;  %v827_v0 = vshrl.u32 %v823_v5, 16  ;;  %v829_v25 = vshrl.u32 %v824_v62, 16  ;;  %v1691_v17 = vadd.s32 %v832_v43, %v828_v39 }
 0x2a8   :  { %v815_v47 = vadd.s32 %v813_v57, %v811_v45  ;;  %v837_v19 = vadd.s32 %v835_v22, %v833_v23  ;;  %v961_v50 = vor.u32 %v960_v28, %v959_v2  ;;  %vm962_vm6 = vcmp.lt.s32.totalorder %v1667_v60, 1 }
 0x2a9   :  { %vm965_vm7 = vcmp.lt.s32.totalorder %v1667_v60, 4  ;;  %vm964_vm8 = vcmp.lt.s32.totalorder %v1667_v60, 3  ;;  %v970_v38 = vsel %vm962_vm6, %v1669_v21, %v1671_v46  ;;  %vm963_vm9 = vcmp.lt.s32.totalorder %v1667_v60, 2 }
 0x2aa   :  { %v816_v36 = vadd.s32 %v815_v47, %v805_v32  ;;  %v838_v51 = vadd.s32 %v837_v19, %v827_v0  ;;  %v971_v42 = vsel %vm965_vm7, %v958_v48, 920167782  ;;  %v974_v52 = vsel %vm962_vm6, %v1671_v46, %v1677_v26 }
 0x2ab   :  { %v972_v13 = vsel %vm964_vm8, %v1677_v26, %v971_v42  ;;  %v786_v33 = vsel %vm780_vm15, %v783_v3, %v785_v20  ;;  %v975_v55 = vsel %vm965_vm7, %v961_v50, 1326507024  ;;  %v979_v58 = vand.u32 65535, %v1620_v11 }
 0x2ac   :  { %v1702_v10 = vadd.s32 %v816_v36, %v807_v16  ;;  %v839_v15 = vadd.s32 %v838_v51, %v829_v25  ;;  %v973_v35 = vsel %vm963_vm9, %v970_v38, %v972_v13  ;;  %v976_v63 = vsel %vm964_vm8, %v958_v48, %v975_v55 }
 0x2ad   :  { %v1003_v4 = vand.u32 65535, %v973_v35  ;;  %v977_v59 = vsel %vm963_vm9, %v974_v52, %v976_v63  ;;  %v980_v3 = vshrl.u32 %v1620_v11, 16  ;;  %v1004_v20 = vshrl.u32 %v973_v35, 16 }
 0x2ae   :  { %vm842_vm10 = vc.u32 %v1702_v10, %v1691_v17  ;;  %v843_v7 = vadd.s32 1, %v839_v15  ;;  %v840_v61 = vmul.u32 %v1615_v9, %v786_v33  ;;  %v981_v40 = vand.u32 65535, %v977_v59 }
 0x2af   :  { %v982_v5 = vshrl.u32 %v977_v59, 16  ;;  %v1006_v1 = vmul.u32 %v1004_v20, %v979_v58  ;;  %v1007_v29 = vmul.u32 %v1003_v4, %v980_v3  ;;  %v946_v32 = vshrl.u32 %v1216_v44, %v1636_v18 }
 0x2b0   :  { %v844_v62 = vsel %vm842_vm10, %v843_v7, %v839_v15  ;;  %v985_v6 = vmul.u32 %v981_v40, %v980_v3  ;;  %v1005_v8 = vmul.u32 %v1003_v4, %v979_v58  ;;  %v1008_v16 = vmul.u32 %v1004_v20, %v980_v3 }
 0x2b1   :  { %v845_v12 = vadd.s32 %v844_v62, %v840_v61  ;;  %v984_v37 = vmul.u32 %v982_v5, %v979_v58  ;;  %v1009_v24 = vshll.u32 %v1006_v1, 16  ;;  %v983_v39 = vmul.u32 %v981_v40, %v979_v58 }
 0x2b2   :  { %v986_v41 = vmul.u32 %v982_v5, %v980_v3  ;;  %v989_v49 = vshll.u32 %v985_v6, 16  ;;  %v1011_v9 = vshll.u32 %v1007_v29, 16  ;;  %v967_v44 = vsel %vm965_vm7, %v1677_v26, 2102212464 }
 0x2b3   :  { %v846_v30 = vadd.s32 536870912, %v845_v12  ;;  %v987_v43 = vshll.u32 %v984_v37, 16  ;;  %vm1013_vm11 = vc.u32 %v1005_v8, %v1009_v24  ;;  %v1015_v45 = vadd.s32 %v1009_v24, %v1005_v8 }
 0x2b4   :  { %v1014_v57 = vsel %vm1013_vm11, 1, %v1219_v27  ;;  %v966_v48 = vsel %vm962_vm6, %v946_v32, %v1669_v21  ;;  %v1010_v0 = vshrl.u32 %v1006_v1, 16  ;;  %v968_v26 = vsel %vm964_vm8, %v1671_v46, %v967_v44 }
 0x2b5   :  { %v1729_v56 = vshrl.u32 %v846_v30, 30  ;;  %vm991_vm12 = vc.u32 %v983_v39, %v987_v43  ;;  %v993_v14 = vadd.s32 %v987_v43, %v983_v39  ;;  %v1016_v23 = vadd.s32 %v1014_v57, %v1008_v16 }
 0x2b6   :  { %v992_v18 = vsel %vm991_vm12, 1, %v1219_v27  ;;  %vm1017_vm13 = vc.u32 %v1015_v45, %v1011_v9  ;;  %v988_v36 = vshrl.u32 %v984_v37, 16  ;;  %v1012_v51 = vshrl.u32 %v1007_v29, 16 }
 0x2b7   :  { %v848_v2 = vshll.u32 %v1729_v56, 30  ;;  %v994_v47 = vadd.s32 %v992_v18, %v986_v41  ;;  %vm995_vm14 = vc.u32 %v993_v14, %v989_v49  ;;  %v1018_v22 = vsel %vm1017_vm13, 1, %v1219_v27 }
 0x2b8   :  { %v996_v28 = vsel %vm995_vm14, 1, %v1219_v27  ;;  %v1020_v25 = vadd.s32 %v1018_v22, %v1016_v23  ;;  %v990_v13 = vshrl.u32 %v985_v6, 16  ;;  %v969_v21 = vsel %vm963_vm9, %v966_v48, %v968_v26 }
 0x2b9   :  { %v849_v19 = vsub.s32 %v845_v12, %v848_v2  ;;  %v998_v50 = vadd.s32 %v996_v28, %v994_v47  ;;  %v1019_v35 = vadd.s32 %v1015_v45, %v1011_v9  ;;  %v1023_v58 = vmul.u32 %v1620_v11, %v969_v21 }
 0x2ba   :  { %v1021_v38 = vadd.s32 %v1020_v25, %v1010_v0  ;;  %v841_v20 = vadd.s32 %v1691_v17, %v1702_v10  ;;  %vm749_vm3 = vcmp.lt.s32.totalorder %v1603_v53, 0  ;;  %vm1756_vm4 = vcmp.le.f32.partialorder %v747_v34, 0.7853982 }
 0x2bb   :  { %vm850_vm15 = vcmp.lt.s32.totalorder %v849_v19, 0  ;;  %v851_v42 = vsub.s32 0, %v849_v19  ;;  %v999_v52 = vadd.s32 %v998_v50, %v988_v36  ;;  %vm932_vm6 = vcmp.lt.s32.totalorder %v1605_v54, 0 }
 0x2bc   :  { %v1022_v33 = vadd.s32 %v1021_v38, %v1012_v51  ;;  %vm1769_vm7 = vcmp.le.f32.partialorder %v930_v31, 0.7853982  ;;  %vm890_vm11 = vweird.f32 %v1603_v53  ;;  %v1084_v41 = vstv %s1589_s27 }
 0x2bd   :  { %v852_v27 = vsel %vm850_vm15, %v851_v42, %v849_v19  ;;  %v1000_v15 = vadd.s32 %v999_v52, %v990_v13  ;;  %v871_v13 = vsub.s32 4, %v1729_v56  ;;  %vm1073_vm15 = vweird.f32 %v1605_v54 }
 0x2be   :  { %v853_v55 = vclz %v852_v27  ;;  %v1026_v63 = vadd.s32 1, %v1022_v33 }
 0x2bf   :  { %vm1025_vm0 = vc.u32 %v1000_v15, %v1019_v35  ;;  %v1024_v14 = vadd.s32 %v1019_v35, %v1000_v15 }
 0x2c0   :  { %v1165_v46 = vadd.s32 4294967294, %v853_v55  ;;  %v1027_v4 = vsel %vm1025_vm0, %v1026_v63, %v1022_v33  ;;  %v872_v55 = vsel %vm749_vm3, %v871_v13, %v1729_v56  ;;  %vm1102_vm0 = vcmask 1024  }
 0x2c1   :  { %v1028_v7 = vadd.s32 %v1027_v4, %v1023_v58  ;;  %v874_v31 = vsel %vm1756_vm4, 0, %v872_v55 }
 0x2c2   :  { %vm1166_vm1 = vcmp.lt.s32.totalorder %v1165_v46, 0 }
 0x2c3   :  { %v856_v59 = vsel %vm1166_vm1, 0, %v1165_v46  ;;  %v1029_v3 = vadd.s32 536870912, %v1028_v7 }
 0x2c4   :  { %v857_v60 = vsub.s32 32, %v856_v59  ;;  %v861_v61 = vsub.s32 4294967266, %v856_v59  ;;  %v858_v5 = vshll.u32 %v849_v19, %v856_v59 }
 0x2c5   :  { %v1750_v40 = vshrl.u32 %v1029_v3, 30 }
 0x2c6   :  { %v859_v62 = vshrl.u32 %v841_v20, %v857_v60  ;;  %v862_v1 = vadd.s32 127, %v861_v61  ;;  %v891_v61 = vand.u32 3, %v874_v31 }
 0x2c7   :  { %v1031_v29 = vshll.u32 %v1750_v40, 30  ;;  %v1054_v59 = vsub.s32 4, %v1750_v40 }
 0x2c8   :  { %v860_v11 = vor.u32 %v859_v62, %v858_v5  ;;  %v863_v12 = vshll.u32 %v862_v1, 23  ;;  %vm893_vm8 = vcmp.eq.s32.totalorder %v891_v61, 0  ;;  %vm896_vm9 = vcmp.eq.s32.totalorder %v891_v61, 2 }
 0x2c9   :  { %v1032_v37 = vsub.s32 %v1028_v7, %v1031_v29  ;;  %v1055_v56 = vsel %vm932_vm6, %v1054_v59, %v1750_v40  ;;  %vm892_vm10 = vcmp.lt.s32.totalorder %v891_v61, 2 }
 0x2ca   :  { %v864_v6 = vor.u32 4788187, %v863_v12  ;;  %v867_v16 = vcvt.s32.f32 %v860_v11 }
 0x2cb   :  { %vm1033_vm2 = vcmp.lt.s32.totalorder %v1032_v37, 0  ;;  %v1034_v32 = vsub.s32 0, %v1032_v37 }
 0x2cc   :  { %v865_v8 = vand.u32 2147483647, %v864_v6  ;;  %v1057_v6 = vsel %vm1769_vm7, 0, %v1055_v56 }
 0x2cd   :  { %v1035_v24 = vsel %vm1033_vm2, %v1034_v32, %v1032_v37 }
 0x2ce   :  { %v868_v30 = vmul.f32 %v867_v16, %v865_v8  ;;  %v1036_v17 = vclz %v1035_v24 }
 0x2d0   :  { %v869_v10 = vxor.u32 2147483648, %v868_v30  ;;  %v1168_v39 = vadd.s32 4294967294, %v1036_v17 }
 0x2d2   :  { %v870_v43 = vsel %vm749_vm3, %v869_v10, %v868_v30  ;;  %vm1169_vm5 = vcmp.lt.s32.totalorder %v1168_v39, 0  ;;  %v1074_v10 = vand.u32 3, %v1057_v6 }
 0x2d3   :  { %v873_v49 = vsel %vm1756_vm4, %v1603_v53, %v870_v43  ;;  %v1039_v9 = vsel %vm1169_vm5, 0, %v1168_v39 }
 0x2d4   :  { %v875_v45 = vmul.f32 %v873_v49, %v873_v49  ;;  %v1040_v57 = vsub.s32 32, %v1039_v9  ;;  %v1044_v44 = vsub.s32 4294967266, %v1039_v9  ;;  %v1041_v18 = vshll.u32 %v1032_v37, %v1039_v9 }
 0x2d5   :  { %vm1076_vm12 = vcmp.eq.s32.totalorder %v1074_v10, 0  ;;  %vm1079_vm13 = vcmp.eq.s32.totalorder %v1074_v10, 2  ;;  %v1086_v9 = vstv %s1591_s28  ;;  %vm1075_vm14 = vcmp.lt.s32.totalorder %v1074_v10, 2 }
 0x2d6   :  { %v1042_v23 = vshrl.u32 %v1024_v14, %v1040_v57  ;;  %v1045_v2 = vadd.s32 127, %v1044_v44  ;;  %v876_v34 = vmul.f32 -0.001358992, %v875_v45  ;;  %v883_v47 = vmul.f32 -0.00019511016, %v875_v45 }
 0x2d8   :  { %v1043_v22 = vor.u32 %v1042_v23, %v1041_v18  ;;  %v1046_v48 = vshll.u32 %v1045_v2, 23  ;;  %v877_v28 = vadd.f32 0.041655596, %v876_v34  ;;  %v884_v0 = vadd.f32 0.008332121, %v883_v47  ;;  %v1093_v47 = vpop.permute.xlu2 %1092 }
 0x2d9   :  { %v1096_v34 = vstv %s1146_s7 }
 0x2da   :  { %v1047_v25 = vor.u32 4788187, %v1046_v48  ;;  %v885_v19 = vmul.f32 %v884_v0, %v875_v45  ;;  %v1050_v36 = vcvt.s32.f32 %v1043_v22  ;;  %v878_v50 = vmul.f32 %v877_v28, %v875_v45 }
 0x2dc   :  { %v1048_v26 = vand.u32 2147483647, %v1047_v25  ;;  %v886_v51 = vadd.f32 -0.16666654, %v885_v19  ;;  %v879_v21 = vadd.f32 -0.4999988, %v878_v50 }
 0x2de   :  { %v1051_v38 = vmul.f32 %v1050_v36, %v1048_v26  ;;  %v887_v42 = vmul.f32 %v886_v51, %v875_v45  ;;  %v880_v58 = vmul.f32 %v879_v21, %v875_v45 }
 0x2e0   :  { %v1052_v52 = vxor.u32 2147483648, %v1051_v38  ;;  %v888_v15 = vadd.f32 1.0, %v887_v42  ;;  %v881_v3 = vadd.f32 1.0, %v880_v58 }
 0x2e2   :  { %v1053_v27 = vsel %vm932_vm6, %v1052_v52, %v1051_v38  ;;  %v889_v46 = vmul.f32 %v888_v15, %v873_v49  ;;  %v897_v29 = vxor.u32 2147483648, %v881_v3 }
 0x2e3   :  { %v1056_v35 = vsel %vm1769_vm7, %v1605_v54, %v1053_v27 }
 0x2e4   :  { %v1058_v63 = vmul.f32 %v1056_v35, %v1056_v35  ;;  %v894_v5 = vxor.u32 2147483648, %v889_v46  ;;  %v898_v16 = vsel %vm896_vm9, %v897_v29, %v889_v46 }
 0x2e6   :  { %v1059_v4 = vmul.f32 -0.001358992, %v1058_v63  ;;  %v1066_v7 = vmul.f32 -0.00019511016, %v1058_v63  ;;  %v895_v37 = vsel %vm893_vm8, %v881_v3, %v894_v5 }
 0x2e7   :  { %v899_v17 = vsel %vm892_vm10, %v895_v37, %v898_v16 }
 0x2e8   :  { %v1060_v20 = vadd.f32 0.041655596, %v1059_v4  ;;  %v1067_v60 = vadd.f32 0.008332121, %v1066_v7  ;;  %v900_v43 = vsel %vm890_vm11, nan, %v899_v17 }
 0x2e9   :  { %v1085_v44 = vmul.f32 %v1084_v41, %v900_v43 }
 0x2ea   :  { %v1061_v62 = vmul.f32 %v1060_v20, %v1058_v63  ;;  %v1068_v1 = vmul.f32 %v1067_v60, %v1058_v63 }
 0x2ec   :  { %v1062_v11 = vadd.f32 -0.4999988, %v1061_v62  ;;  %v1069_v12 = vadd.f32 -0.16666654, %v1068_v1 }
 0x2ee   :  { %v1063_v32 = vmul.f32 %v1062_v11, %v1058_v63  ;;  %v1070_v8 = vmul.f32 %v1069_v12, %v1058_v63 }
 0x2f0   :  { %v1064_v24 = vadd.f32 1.0, %v1063_v32  ;;  %v1071_v30 = vadd.f32 1.0, %v1070_v8 }
 0x2f2   :  { %v1072_v40 = vmul.f32 %v1071_v30, %v1056_v35  ;;  %v1080_v39 = vxor.u32 2147483648, %v1064_v24 }
 0x2f4   :  { %v1077_v49 = vxor.u32 2147483648, %v1072_v40  ;;  %v1081_v14 = vsel %vm1079_vm13, %v1080_v39, %v1072_v40 }
 0x2f6   :  { %v1078_v45 = vsel %vm1076_vm12, %v1064_v24, %v1077_v49 }
 0x2f7   :  { %v1082_v57 = vsel %vm1075_vm14, %v1078_v45, %v1081_v14 }
 0x2f8   :  { %v1083_v18 = vsel %vm1073_vm15, nan, %v1082_v57 }
 0x2f9   :  { %v1087_v23 = vmul.f32 %v1086_v9, %v1083_v18 }
 0x2fb   :  { %v1088_v2 = vadd.f32 %v1087_v23, %v1085_v44 }
 0x2fd   :  { %v1095_v53 = vadd.f32 %v1093_v47, %v1088_v2 }
 0x2ff   :  { %v1097_v22 = vadd.f32 %v1096_v34, %v1095_v53 }
 0x301   :  { %1099 = vrot.lane.b32.xlu1 %v1097_v22, %s1223_s9 }
 0x373   :  { %v1100_v48 = vpop.permute.xlu1 %1099 }
 0x374   :  { %1103 = vst.msk [vmem:[%s1798_s2] sm:$0x3] %vm1102_vm0, %v1100_v48 }
 0x375   :  { %1108 = vsyncpa [#allocation3], 1 }

</bundles_post_ra>
